<compile_context>
chip_gen: v7x
topology: tpu7x:2x2x1
jax: 0.10.0
libtpu: 0.0.40
codegen_flags: <defaults>
</compile_context>

<pallas_src>
import math

import jax
import jax.numpy as jnp
from jax.experimental import pallas as pl
from jax.experimental.pallas import tpu as pltpu

B, S, D_MODEL, H, D_FF = 2, 8, 32, 4, 64
D_K = D_MODEL // H
EPS = 1e-6


def _layer_norm(t, alpha, bias):
    # Reproduces LayerNormalzation.forward exactly as written in the source.
    mean = jnp.mean(t, axis=-1, keepdims=True)
    var = jnp.sum((t - mean) ** 2, axis=-1, keepdims=True) / (t.shape[-1] - 1)
    std = jnp.sqrt(var)                      # unbiased std, torch default
    return alpha * (t - mean / (std + EPS)) + bias


def encoder_block_kernel(scal_ref, x_ref, bias_ref,
                         wqkv_ref, bqkv_ref, wo_ref, bo_ref,
                         w1_ref, b1_ref, w2_ref, b2_ref,
                         o_ref):
    x = x_ref[...]                           # (B*S, D_MODEL), batch flattened
    a1, g1 = scal_ref[0], scal_ref[1]        # LayerNorm #0 alpha / bias
    a2, g2 = scal_ref[2], scal_ref[3]        # LayerNorm #1 alpha / bias

    # ---------- residual connection 0: pre-norm multi-head self-attention ----
    xn = _layer_norm(x, a1, g1)
    # Fused Q/K/V projection: one (B*S, D) x (D, 3D) matmul; weight columns are
    # already grouped (q|k|v) x (head, d_k) by the init-time prep.
    qkv = jnp.dot(xn, wqkv_ref[...],
                  preferred_element_type=jnp.float32) + bqkv_ref[...]

    # Single layout transform to head-batched form: (B*S, 3D) -> (B, 3H, S, Dk).
    # q/k/v then come out as free major-axis slices (no lane-unaligned extracts).
    qkv = jnp.transpose(qkv.reshape(B, S, 3 * H, D_K), (0, 2, 1, 3))
    q = qkv[:, 0 * H:1 * H].reshape(B * H, S, D_K)
    k = qkv[:, 1 * H:2 * H].reshape(B * H, S, D_K)
    v = qkv[:, 2 * H:3 * H].reshape(B * H, S, D_K)

    # All B*H heads at once: one batched QK^T, one softmax, one batched P@V.
    s = jnp.einsum('bqd,bkd->bqk', q, k,
                   preferred_element_type=jnp.float32) * (1.0 / math.sqrt(D_K))
    s = s + bias_ref[...]                    # additive mask bias (wrapper-built)
    s = s - jnp.max(s, axis=-1, keepdims=True)
    p = jnp.exp(s)
    p = p / jnp.sum(p, axis=-1, keepdims=True)
    ctx = jnp.einsum('bqk,bkd->bqd', p, v, preferred_element_type=jnp.float32)

    # Merge heads back and run ONE (B*S, D) x (D, D) output projection.
    ctx = jnp.transpose(ctx.reshape(B, H, S, D_K), (0, 2, 1, 3))
    ctx = ctx.reshape(B * S, D_MODEL)
    attn = jnp.dot(ctx, wo_ref[...],
                   preferred_element_type=jnp.float32) + bo_ref[...]
    x1 = x + attn                            # dropout == identity (eval mode)

    # ---------- residual connection 1: pre-norm feed-forward -----------------
    # TODO(synk): the reference lambda returns the FFN module without calling
    # it; the clearly intended FFN application is implemented here.
    xn2 = _layer_norm(x1, a2, g2)
    h1 = jnp.maximum(
        jnp.dot(xn2, w1_ref[...], preferred_element_type=jnp.float32) + b1_ref[...],
        0.0)
    ff = jnp.dot(h1, w2_ref[...], preferred_element_type=jnp.float32) + b2_ref[...]
    o_ref[...] = x1 + ff


def encoder_block(x, mask, params):
    """x: (B, S, D_MODEL) f32; mask: (B, S, S), nonzero == visible."""
    x2d = x.reshape(B * S, D_MODEL)
    # Precompute the additive attention-mask bias in XLA, pre-broadcast to the
    # head-batched (B*H, S, S) layout the kernel uses.
    bias = jnp.where(mask == 0.0, jnp.float32(-1e9), jnp.float32(0.0))
    bias = jnp.broadcast_to(bias[:, None], (B, H, S, S)).reshape(B * H, S, S)

    vmem = pl.BlockSpec(memory_space=pltpu.MemorySpace.VMEM)
    smem = pl.BlockSpec(memory_space=pltpu.MemorySpace.SMEM)
    out2d = pl.pallas_call(
        encoder_block_kernel,
        out_shape=jax.ShapeDtypeStruct((B * S, D_MODEL), jnp.float32),
        # No grid, no index_maps, no dimension_semantics: one invocation with
        # every operand a full resident VMEM block (LN scalars in SMEM).
        in_specs=[smem] + [vmem] * 10,
        out_specs=vmem,
    )(params["ln_scalars"], x2d, bias,
      params["wqkv_t"], params["bqkv"], params["wo_t"], params["bo"],
      params["w1_t"], params["b1"], params["w2_t"], params["b2"])
    return out2d.reshape(B, S, D_MODEL)


def init_params(key):
    def linear(key, out_f, in_f):
        kw, kb = jax.random.split(key)
        bound = 1.0 / math.sqrt(in_f)        # torch.nn.Linear default init
        w = jax.random.uniform(kw, (out_f, in_f), jnp.float32, -bound, bound)
        b = jax.random.uniform(kb, (1, out_f), jnp.float32, -bound, bound)
        return w, b

    keys = jax.random.split(key, 6)
    wq, bq = linear(keys[0], D_MODEL, D_MODEL)
    wk, bk = linear(keys[1], D_MODEL, D_MODEL)
    wv, bv = linear(keys[2], D_MODEL, D_MODEL)
    wo, bo = linear(keys[3], D_MODEL, D_MODEL)
    w1, b1 = linear(keys[4], D_FF, D_MODEL)
    w2, b2 = linear(keys[5], D_MODEL, D_FF)
    # One-time weight prep (hoisted out of the per-call wrapper): fuse Q/K/V and
    # pre-transpose every nn.Linear weight to (in, out).
    return dict(
        wqkv_t=jnp.concatenate([wq, wk, wv], axis=0).T,   # (D, 3D)
        bqkv=jnp.concatenate([bq, bk, bv], axis=1),       # (1, 3D)
        wo_t=wo.T, bo=bo,                                 # (D, D), (1, D)
        w1_t=w1.T, b1=b1,                                 # (D, D_FF), (1, D_FF)
        w2_t=w2.T, b2=b2,                                 # (D_FF, D), (1, D)
        # alpha=1, bias=0 for both LayerNorms (torch init of the scalar params)
        ln_scalars=jnp.array([1.0, 0.0, 1.0, 0.0], dtype=jnp.float32),
    )


if __name__ == "__main__":
    root = jax.random.PRNGKey(0)
    k_x, k_p = jax.random.split(root)
    x = jax.random.normal(k_x, (B, S, D_MODEL), dtype=jnp.float32)
    src_mask = jnp.ones((B, S, S), dtype=jnp.float32)   # all positions visible
    params = init_params(k_p)

    out = encoder_block(x, src_mask, params)
    out = jax.block_until_ready(out)

    assert out.shape == (B, S, D_MODEL)
    assert bool(jnp.all(jnp.isfinite(out)))
    print("KERNEL_OK")
</pallas_src>

<mosaic_0001>
module attributes {stable_mosaic.version = 11 : i64} {
  func.func @encoder_block_kernel(%arg0: memref<4xf32, #tpu.memory_space<smem>>, %arg1: memref<16x32xf32, #tpu.memory_space<vmem>>, %arg2: memref<8x8x8xf32, #tpu.memory_space<vmem>>, %arg3: memref<32x96xf32, #tpu.memory_space<vmem>>, %arg4: memref<1x96xf32, #tpu.memory_space<vmem>>, %arg5: memref<32x32xf32, #tpu.memory_space<vmem>>, %arg6: memref<1x32xf32, #tpu.memory_space<vmem>>, %arg7: memref<32x64xf32, #tpu.memory_space<vmem>>, %arg8: memref<1x64xf32, #tpu.memory_space<vmem>>, %arg9: memref<64x32xf32, #tpu.memory_space<vmem>>, %arg10: memref<1x32xf32, #tpu.memory_space<vmem>>, %arg11: memref<16x32xf32, #tpu.memory_space<vmem>>) attributes {dimension_semantics = [], scalar_prefetch = 0 : i64, scratch_operands = 0 : i64, tpu.core_type = #tpu.core_type<tc>} {
    %c0 = arith.constant 0 : index
    %c0_0 = arith.constant 0 : index
    %0 = vector.load %arg1[%c0, %c0_0] : memref<16x32xf32, #tpu.memory_space<vmem>>, vector<16x32xf32>
    %c0_1 = arith.constant 0 : index
    %1 = memref.load %arg0[%c0_1] : memref<4xf32, #tpu.memory_space<smem>>
    %c1 = arith.constant 1 : index
    %2 = memref.load %arg0[%c1] : memref<4xf32, #tpu.memory_space<smem>>
    %c2 = arith.constant 2 : index
    %3 = memref.load %arg0[%c2] : memref<4xf32, #tpu.memory_space<smem>>
    %c3 = arith.constant 3 : index
    %4 = memref.load %arg0[%c3] : memref<4xf32, #tpu.memory_space<smem>>
    %cst = arith.constant dense<0.000000e+00> : vector<16xf32>
    %5 = vector.multi_reduction <add>, %0, %cst [1] : vector<16x32xf32> to vector<16xf32>
    %6 = vector.shape_cast %5 : vector<16xf32> to vector<16x1xf32>
    %cst_2 = arith.constant 3.200000e+01 : f32
    %7 = vector.broadcast %cst_2 : f32 to vector<16x1xf32>
    %8 = arith.divf %6, %7 : vector<16x1xf32>
    %9 = vector.broadcast %8 : vector<16x1xf32> to vector<16x32xf32>
    %10 = arith.subf %0, %9 : vector<16x32xf32>
    %11 = arith.mulf %10, %10 : vector<16x32xf32>
    %cst_3 = arith.constant dense<0.000000e+00> : vector<16xf32>
    %12 = vector.multi_reduction <add>, %11, %cst_3 [1] : vector<16x32xf32> to vector<16xf32>
    %13 = vector.shape_cast %12 : vector<16xf32> to vector<16x1xf32>
    %cst_4 = arith.constant 3.100000e+01 : f32
    %14 = vector.broadcast %cst_4 : f32 to vector<16x1xf32>
    %15 = arith.divf %13, %14 : vector<16x1xf32>
    %16 = math.sqrt %15 : vector<16x1xf32>
    %cst_5 = arith.constant 9.99999997E-7 : f32
    %17 = vector.broadcast %cst_5 : f32 to vector<16x1xf32>
    %18 = arith.addf %16, %17 : vector<16x1xf32>
    %19 = arith.divf %8, %18 : vector<16x1xf32>
    %20 = vector.broadcast %19 : vector<16x1xf32> to vector<16x32xf32>
    %21 = arith.subf %0, %20 : vector<16x32xf32>
    %22 = vector.broadcast %1 : f32 to vector<16x32xf32>
    %23 = arith.mulf %22, %21 : vector<16x32xf32>
    %24 = vector.broadcast %2 : f32 to vector<16x32xf32>
    %25 = arith.addf %23, %24 : vector<16x32xf32>
    %c0_6 = arith.constant 0 : index
    %c0_7 = arith.constant 0 : index
    %26 = vector.load %arg3[%c0_6, %c0_7] : memref<32x96xf32, #tpu.memory_space<vmem>>, vector<32x96xf32>
    %cst_8 = arith.constant dense<0.000000e+00> : vector<16x96xf32>
    %27 = tpu.matmul %25, %26, %cst_8 {dimension_numbers = #tpu.dot_dimension_numbers<[1], [0], [0], [1], [0, 0, 1, 1], [], []>} : vector<16x32xf32>, vector<32x96xf32>, vector<16x96xf32> -> vector<16x96xf32>
    %c0_9 = arith.constant 0 : index
    %c0_10 = arith.constant 0 : index
    %28 = vector.load %arg4[%c0_9, %c0_10] : memref<1x96xf32, #tpu.memory_space<vmem>>, vector<1x96xf32>
    %29 = vector.broadcast %28 : vector<1x96xf32> to vector<16x96xf32>
    %30 = arith.addf %27, %29 : vector<16x96xf32>
    %31 = vector.shape_cast %30 : vector<16x96xf32> to vector<2x8x12x8xf32>
    %32 = tpu.transpose %31, [0, 2, 1, 3] : vector<2x8x12x8xf32> -> vector<2x12x8x8xf32>
    %33 = vector.extract_strided_slice %32 {offsets = [0, 0, 0, 0], sizes = [2, 4, 8, 8], strides = [1, 1, 1, 1]} : vector<2x12x8x8xf32> to vector<2x4x8x8xf32>
    %34 = vector.shape_cast %33 : vector<2x4x8x8xf32> to vector<8x8x8xf32>
    %35 = vector.extract_strided_slice %32 {offsets = [0, 4, 0, 0], sizes = [2, 4, 8, 8], strides = [1, 1, 1, 1]} : vector<2x12x8x8xf32> to vector<2x4x8x8xf32>
    %36 = vector.shape_cast %35 : vector<2x4x8x8xf32> to vector<8x8x8xf32>
    %37 = vector.extract_strided_slice %32 {offsets = [0, 8, 0, 0], sizes = [2, 4, 8, 8], strides = [1, 1, 1, 1]} : vector<2x12x8x8xf32> to vector<2x4x8x8xf32>
    %38 = vector.shape_cast %37 : vector<2x4x8x8xf32> to vector<8x8x8xf32>
    "tpu.trace_start"() <{level = 10 : i32, message = "bqd,bkd->bqk"}> : () -> ()
    %cst_11 = arith.constant dense<0.000000e+00> : vector<8x8x8xf32>
    %39 = tpu.matmul %34, %36, %cst_11 {dimension_numbers = #tpu.dot_dimension_numbers<[2], [2], [1], [1], [0, 0, 0, 1, 1, 1], [0], [0]>} : vector<8x8x8xf32>, vector<8x8x8xf32>, vector<8x8x8xf32> -> vector<8x8x8xf32>
    "tpu.trace_stop"() : () -> ()
    %cst_12 = arith.constant 0.353553385 : f32
    %40 = vector.broadcast %cst_12 : f32 to vector<8x8x8xf32>
    %41 = arith.mulf %39, %40 : vector<8x8x8xf32>
    %c0_13 = arith.constant 0 : index
    %c0_14 = arith.constant 0 : index
    %c0_15 = arith.constant 0 : index
    %42 = vector.load %arg2[%c0_13, %c0_14, %c0_15] : memref<8x8x8xf32, #tpu.memory_space<vmem>>, vector<8x8x8xf32>
    %43 = arith.addf %41, %42 : vector<8x8x8xf32>
    %cst_16 = arith.constant dense<0xFF800000> : vector<8x8xf32>
    %44 = vector.multi_reduction <maximumf>, %43, %cst_16 [2] : vector<8x8x8xf32> to vector<8x8xf32>
    %45 = vector.shape_cast %44 : vector<8x8xf32> to vector<8x8x1xf32>
    %46 = vector.broadcast %45 : vector<8x8x1xf32> to vector<8x8x8xf32>
    %47 = arith.subf %43, %46 : vector<8x8x8xf32>
    %48 = math.exp %47 : vector<8x8x8xf32>
    %cst_17 = arith.constant dense<0.000000e+00> : vector<8x8xf32>
    %49 = vector.multi_reduction <add>, %48, %cst_17 [2] : vector<8x8x8xf32> to vector<8x8xf32>
    %50 = vector.shape_cast %49 : vector<8x8xf32> to vector<8x8x1xf32>
    %51 = vector.broadcast %50 : vector<8x8x1xf32> to vector<8x8x8xf32>
    %52 = arith.divf %48, %51 : vector<8x8x8xf32>
    "tpu.trace_start"() <{level = 10 : i32, message = "bqk,bkd->bqd"}> : () -> ()
    %cst_18 = arith.constant dense<0.000000e+00> : vector<8x8x8xf32>
    %53 = tpu.matmul %52, %38, %cst_18 {dimension_numbers = #tpu.dot_dimension_numbers<[2], [1], [1], [2], [0, 0, 0, 1, 1, 2], [0], [0]>} : vector<8x8x8xf32>, vector<8x8x8xf32>, vector<8x8x8xf32> -> vector<8x8x8xf32>
    "tpu.trace_stop"() : () -> ()
    %54 = vector.shape_cast %53 : vector<8x8x8xf32> to vector<2x4x8x8xf32>
    %55 = tpu.transpose %54, [0, 2, 1, 3] : vector<2x4x8x8xf32> -> vector<2x8x4x8xf32>
    %56 = vector.shape_cast %55 : vector<2x8x4x8xf32> to vector<16x32xf32>
    %c0_19 = arith.constant 0 : index
    %c0_20 = arith.constant 0 : index
    %57 = vector.load %arg5[%c0_19, %c0_20] : memref<32x32xf32, #tpu.memory_space<vmem>>, vector<32x32xf32>
    %cst_21 = arith.constant dense<0.000000e+00> : vector<16x32xf32>
    %58 = tpu.matmul %56, %57, %cst_21 {dimension_numbers = #tpu.dot_dimension_numbers<[1], [0], [0], [1], [0, 0, 1, 1], [], []>} : vector<16x32xf32>, vector<32x32xf32>, vector<16x32xf32> -> vector<16x32xf32>
    %c0_22 = arith.constant 0 : index
    %c0_23 = arith.constant 0 : index
    %59 = vector.load %arg6[%c0_22, %c0_23] : memref<1x32xf32, #tpu.memory_space<vmem>>, vector<1x32xf32>
    %60 = vector.broadcast %59 : vector<1x32xf32> to vector<16x32xf32>
    %61 = arith.addf %58, %60 : vector<16x32xf32>
    %62 = arith.addf %0, %61 : vector<16x32xf32>
    %cst_24 = arith.constant dense<0.000000e+00> : vector<16xf32>
    %63 = vector.multi_reduction <add>, %62, %cst_24 [1] : vector<16x32xf32> to vector<16xf32>
    %64 = vector.shape_cast %63 : vector<16xf32> to vector<16x1xf32>
    %cst_25 = arith.constant 3.200000e+01 : f32
    %65 = vector.broadcast %cst_25 : f32 to vector<16x1xf32>
    %66 = arith.divf %64, %65 : vector<16x1xf32>
    %67 = vector.broadcast %66 : vector<16x1xf32> to vector<16x32xf32>
    %68 = arith.subf %62, %67 : vector<16x32xf32>
    %69 = arith.mulf %68, %68 : vector<16x32xf32>
    %cst_26 = arith.constant dense<0.000000e+00> : vector<16xf32>
    %70 = vector.multi_reduction <add>, %69, %cst_26 [1] : vector<16x32xf32> to vector<16xf32>
    %71 = vector.shape_cast %70 : vector<16xf32> to vector<16x1xf32>
    %cst_27 = arith.constant 3.100000e+01 : f32
    %72 = vector.broadcast %cst_27 : f32 to vector<16x1xf32>
    %73 = arith.divf %71, %72 : vector<16x1xf32>
    %74 = math.sqrt %73 : vector<16x1xf32>
    %cst_28 = arith.constant 9.99999997E-7 : f32
    %75 = vector.broadcast %cst_28 : f32 to vector<16x1xf32>
    %76 = arith.addf %74, %75 : vector<16x1xf32>
    %77 = arith.divf %66, %76 : vector<16x1xf32>
    %78 = vector.broadcast %77 : vector<16x1xf32> to vector<16x32xf32>
    %79 = arith.subf %62, %78 : vector<16x32xf32>
    %80 = vector.broadcast %3 : f32 to vector<16x32xf32>
    %81 = arith.mulf %80, %79 : vector<16x32xf32>
    %82 = vector.broadcast %4 : f32 to vector<16x32xf32>
    %83 = arith.addf %81, %82 : vector<16x32xf32>
    %c0_29 = arith.constant 0 : index
    %c0_30 = arith.constant 0 : index
    %84 = vector.load %arg7[%c0_29, %c0_30] : memref<32x64xf32, #tpu.memory_space<vmem>>, vector<32x64xf32>
    %cst_31 = arith.constant dense<0.000000e+00> : vector<16x64xf32>
    %85 = tpu.matmul %83, %84, %cst_31 {dimension_numbers = #tpu.dot_dimension_numbers<[1], [0], [0], [1], [0, 0, 1, 1], [], []>} : vector<16x32xf32>, vector<32x64xf32>, vector<16x64xf32> -> vector<16x64xf32>
    %c0_32 = arith.constant 0 : index
    %c0_33 = arith.constant 0 : index
    %86 = vector.load %arg8[%c0_32, %c0_33] : memref<1x64xf32, #tpu.memory_space<vmem>>, vector<1x64xf32>
    %87 = vector.broadcast %86 : vector<1x64xf32> to vector<16x64xf32>
    %88 = arith.addf %85, %87 : vector<16x64xf32>
    %cst_34 = arith.constant 0.000000e+00 : f32
    %89 = vector.broadcast %cst_34 : f32 to vector<16x64xf32>
    %90 = arith.maximumf %88, %89 : vector<16x64xf32>
    %c0_35 = arith.constant 0 : index
    %c0_36 = arith.constant 0 : index
    %91 = vector.load %arg9[%c0_35, %c0_36] : memref<64x32xf32, #tpu.memory_space<vmem>>, vector<64x32xf32>
    %cst_37 = arith.constant dense<0.000000e+00> : vector<16x32xf32>
    %92 = tpu.matmul %90, %91, %cst_37 {dimension_numbers = #tpu.dot_dimension_numbers<[1], [0], [0], [1], [0, 0, 1, 1], [], []>} : vector<16x64xf32>, vector<64x32xf32>, vector<16x32xf32> -> vector<16x32xf32>
    %c0_38 = arith.constant 0 : index
    %c0_39 = arith.constant 0 : index
    %93 = vector.load %arg10[%c0_38, %c0_39] : memref<1x32xf32, #tpu.memory_space<vmem>>, vector<1x32xf32>
    %94 = vector.broadcast %93 : vector<1x32xf32> to vector<16x32xf32>
    %95 = arith.addf %92, %94 : vector<16x32xf32>
    %96 = arith.addf %62, %95 : vector<16x32xf32>
    %c0_40 = arith.constant 0 : index
    %c0_41 = arith.constant 0 : index
    %97 = vector.load %arg11[%c0_40, %c0_41] : memref<16x32xf32, #tpu.memory_space<vmem>>, vector<16x32xf32>
    tpu.vector_store %arg11[%c0_40, %c0_41], %96 {strides = array<i32>} : memref<16x32xf32, #tpu.memory_space<vmem>>, vector<16x32xf32>,
    return
  }
}

</mosaic_0001>

<bundles_post_ra>
// kernel: tpu_custom_call.1
= control target key start
LH: loop header
LB: loop body
LE: loop exit
PB: predicated region body
PF: predicated region fallthrough
CT: control target
= control target key end

     0   :  { %16 = vsyncpa [#allocation5], 0  ;;  %s4273_s0 = inlined_call_operand.vmem [shape: f32[4], index: 0, kind: input, shape index: {}]   ;;  %s4274_s1 = inlined_call_operand.hbm [shape: f32[16,32], index: 1, kind: input, shape index: {}]   ;;  %s4275_s2 = inlined_call_operand.vmem [shape: f32[8,8,8], index: 2, kind: input, shape index: {}]   ;;  %s4276_s3 = inlined_call_operand.vmem [shape: f32[32,96], index: 3, kind: input, shape index: {}]   ;;  %s4277_s4 = inlined_call_operand.vmem [shape: f32[1,96], index: 4, kind: input, shape index: {}]   ;;  %s4278_s5 = inlined_call_operand.hbm [shape: f32[32,32], index: 5, kind: input, shape index: {}]   ;;  %s4279_s6 = inlined_call_operand.hbm [shape: f32[1,32], index: 6, kind: input, shape index: {}]   ;;  %s4280_s7 = inlined_call_operand.hbm [shape: f32[32,64], index: 7, kind: input, shape index: {}]   ;;  %s4281_s8 = inlined_call_operand.hbm [shape: f32[1,64], index: 8, kind: input, shape index: {}]   ;;  %s4282_s9 = inlined_call_operand.vmem [shape: f32[64,32], index: 9, kind: input, shape index: {}]   ;;  %s4283_s10 = inlined_call_operand.vmem [shape: f32[1,32], index: 10, kind: input, shape index: {}]   ;;  %s4284_s11 = inlined_call_operand.hbm [shape: f32[16,32], index: 11, kind: output, shape index: {}]  }
   0x1   :  { %17 = vsyncpa [#allocation3], 0 }
   0x2   :  { %18 = vsyncpa [#allocation8], 0 }
   0x3   :  { %19 = vsyncpa [#allocation11], 0 }
   0x4   :  { %20 = vsyncpa [#allocation4], 0  ;;  %s3640_s17 = smov [#allocation7]   ;;  %s3641_s19 = smov [#allocation10]  }
   0x5   :  { %s54_s18 = sshll.u32 %s3640_s17, 4  ;;  %s76_s20 = sshll.u32 %s3641_s19, 4  ;;  %s55_s18 = int_to_ptr.vmem [resolvable:$true] %s54_s18  ;;  %s3726_s20 = int_to_ptr.vmem [resolvable:$true] %s76_s20 }
   0x6   :  { %s3486_s23 = scalar_lea.hbm %s4278_s5, 512 }
   0x7   :  { %p3487_p0 = scmp.ne.s32.totalorder %s4278_s5, %s3486_s23  ;;  %p3490_p1 = scmp.lt.u32.totalorder %s3486_s23, %s4278_s5 }
   0x9   :  { %p3492_p2 = pnand %p3490_p1, %p3487_p0 }
   0xb   :  { %3495 = shalt.err (!%p3492_p2)
}
   0xc   :  { %s3496_s28 = scalar_lea.vmem %s55_s18, 512  ;;  %p3501_p4 = scmp.lt.s32.totalorder %s55_s18, %s55_s18 }
   0xd   :  { %p3497_p3 = scmp.ne.s32.totalorder %s55_s18, %s3496_s28  ;;  %p3502_p5 = scmp.lt.s32.totalorder %s3496_s28, %s3496_s28 }
   0xf   :  { %p3503_p6 = por %p3502_p5, %p3501_p4 }
  0x11   :  { %p3504_p7 = pnand %p3503_p6, %p3497_p3 }
  0x13   :  { %3507 = shalt.err (!%p3504_p7)
}
  0x14   :  { %s3642_s29 = smov 128   ;;  %s3643_s30 = smov 8  }
  0x15   :  { %60 = dma.hbm_to_vmem [thread:$0]  %s4278_s5, 512, %s55_s18, [#allocation8], %s3642_s29, %s3642_s29, %s3643_s30  }
  0x16   :  { %s3508_s16 = scalar_lea.hbm %s4280_s7, 512 }
  0x17   :  { %p3509_p8 = scmp.ne.s32.totalorder %s4280_s7, %s3508_s16  ;;  %p3512_p9 = scmp.lt.u32.totalorder %s3508_s16, %s4280_s7 }
  0x19   :  { %p3514_p10 = pnand %p3512_p9, %p3509_p8 }
  0x1b   :  { %3517 = shalt.err (!%p3514_p10)
}
  0x1c   :  { %s3518_s23 = scalar_lea.vmem %s3726_s20, 512  ;;  %p3523_p12 = scmp.lt.s32.totalorder %s3726_s20, %s3726_s20 }
  0x1d   :  { %p3519_p11 = scmp.ne.s32.totalorder %s3726_s20, %s3518_s23  ;;  %p3524_p13 = scmp.lt.s32.totalorder %s3518_s23, %s3518_s23 }
  0x1f   :  { %p3525_p0 = por %p3524_p13, %p3523_p12 }
  0x21   :  { %p3526_p1 = pnand %p3525_p0, %p3519_p11 }
  0x23   :  { %3529 = shalt.err (!%p3526_p1)
}
  0x24   :  { %82 = dma.hbm_to_vmem [thread:$0]  %s4280_s7, 512, %s3726_s20, [#allocation11], %s3642_s29, %s3642_s29, %s3643_s30  }
  0x25   :  { %s27_s26 = sshll.u32 %s4273_s0, 4  ;;  %s28_s26 = int_to_ptr.vmem [resolvable:$true] %s27_s26 }
  0x26   :  { %s3530_s27 = scalar_lea.vmem %s28_s26, 16  ;;  %p3535_p3 = scmp.lt.s32.totalorder %s28_s26, %s28_s26 }
  0x27   :  { %p3531_p2 = scmp.ne.s32.totalorder %s28_s26, %s3530_s27  ;;  %p3536_p4 = scmp.lt.s32.totalorder %s3530_s27, %s3530_s27 }
  0x29   :  { %p3537_p5 = por %p3536_p4, %p3535_p3 }
  0x2b   :  { %p3538_p6 = pnand %p3537_p5, %p3531_p2 }
  0x2d   :  { %3541 = shalt.err (!%p3538_p6)
}
  0x2e   :  { %s3644_s28 = smov [#allocation2]   ;;  %s3645_s12 = smov [#allocation6]  }
  0x2f   :  { %30 = dma.vmem_to_smem %s28_s26, 16, %s3644_s28, [#allocation5]  }
  0x30   :  { %s36_s13 = sshll.u32 %s3645_s12, 4  ;;  %s3646_s14 = smov [#allocation9]   ;;  %s37_s13 = int_to_ptr.vmem [resolvable:$true] %s36_s13 }
  0x31   :  { %s67_s15 = sshll.u32 %s3646_s14, 4  ;;  %s3542_s16 = scalar_lea.hbm %s4274_s1, 256  ;;  %s68_s15 = int_to_ptr.vmem [resolvable:$true] %s67_s15 }
  0x32   :  { %p3543_p7 = scmp.ne.s32.totalorder %s4274_s1, %s3542_s16  ;;  %p3546_p8 = scmp.lt.u32.totalorder %s3542_s16, %s4274_s1 }
  0x34   :  { %p3548_p9 = pnand %p3546_p8, %p3543_p7 }
  0x36   :  { %3551 = shalt.err (!%p3548_p9)
}
  0x37   :  { %s3552_s22 = scalar_lea.vmem %s37_s13, 256  ;;  %p3557_p11 = scmp.lt.s32.totalorder %s37_s13, %s37_s13 }
  0x38   :  { %p3553_p10 = scmp.ne.s32.totalorder %s37_s13, %s3552_s22  ;;  %p3558_p12 = scmp.lt.s32.totalorder %s3552_s22, %s3552_s22 }
  0x3a   :  { %p3559_p13 = por %p3558_p12, %p3557_p11 }
  0x3c   :  { %p3560_p0 = pnand %p3559_p13, %p3553_p10 }
  0x3e   :  { %3563 = shalt.err (!%p3560_p0)
}
  0x3f   :  { %42 = dma.hbm_to_vmem [thread:$0]  %s4274_s1, 256, %s37_s13, [#allocation3], %s3642_s29, %s3642_s29, %s3643_s30  }
  0x40   :  { %s3564_s25 = scalar_lea.hbm %s4279_s6, 16 }
  0x41   :  { %p3565_p1 = scmp.ne.s32.totalorder %s4279_s6, %s3564_s25  ;;  %p3568_p2 = scmp.lt.u32.totalorder %s3564_s25, %s4279_s6 }
  0x43   :  { %p3570_p3 = pnand %p3568_p2, %p3565_p1 }
  0x45   :  { %3573 = shalt.err (!%p3570_p3)
}
  0x46   :  { %s3574_s14 = scalar_lea.vmem %s68_s15, 16  ;;  %s3578_s7 = scalar_lea.vmem %s68_s15, 32 }
  0x47   :  { %p3575_p4 = scmp.ne.s32.totalorder %s68_s15, %s3574_s14  ;;  %p3579_p5 = scmp.lt.s32.totalorder %s68_s15, %s68_s15 }
  0x48   :  { %p3580_p6 = scmp.lt.s32.totalorder %s3578_s7, %s3574_s14 }
  0x4a   :  { %p3581_p7 = por %p3580_p6, %p3579_p5 }
  0x4c   :  { %p3582_p8 = pnand %p3581_p7, %p3575_p4 }
  0x4e   :  { %3585 = shalt.err (!%p3582_p8)
}
  0x4f   :  { %70 = dma.hbm_to_vmem [thread:$0]  %s4279_s6, 16, %s68_s15, [#allocation8]  }
  0x50   :  { %s3647_s20 = smov [#allocation12]   ;;  %s3586_s19 = scalar_lea.hbm %s4281_s8, 16 }
  0x51   :  { %s89_s16 = sshll.u32 %s3647_s20, 4  ;;  %p3587_p9 = scmp.ne.s32.totalorder %s4281_s8, %s3586_s19  ;;  %s90_s16 = int_to_ptr.vmem [resolvable:$true] %s89_s16 }
  0x52   :  { %p3590_p10 = scmp.lt.u32.totalorder %s3586_s19, %s4281_s8 }
  0x54   :  { %p3592_p11 = pnand %p3590_p10, %p3587_p9 }
  0x56   :  { %3595 = shalt.err (!%p3592_p11)
}
  0x57   :  { %s3596_s18 = scalar_lea.vmem %s90_s16, 16  ;;  %s3600_s6 = scalar_lea.vmem %s90_s16, 32 }
  0x58   :  { %p3597_p12 = scmp.ne.s32.totalorder %s90_s16, %s3596_s18  ;;  %p3601_p13 = scmp.lt.s32.totalorder %s90_s16, %s90_s16 }
  0x59   :  { %p3602_p0 = scmp.lt.s32.totalorder %s3600_s6, %s3596_s18 }
  0x5b   :  { %p3603_p1 = por %p3602_p0, %p3601_p13 }
  0x5d   :  { %p3604_p2 = pnand %p3603_p1, %p3597_p12 }
  0x5f   :  { %3607 = shalt.err (!%p3604_p2)
}
  0x60   :  { %92 = dma.hbm_to_vmem [thread:$0]  %s4281_s8, 16, %s90_s16, [#allocation11]  }
  0x61   :  { %3630 = dma.done.wait [#allocation5], 16  }
  0x62   :  { %3631 = vsyncadd [#allocation5], 4294967280 }
  0x63   :  { %3632 = dma.done.wait [#allocation3], 256  }
  0x64   :  { %3633 = vsyncadd [#allocation3], 4294967040 }
  0x65   :  { %3634 = dma.done.wait [#allocation8], 528  }
  0x66   :  { %3635 = vsyncadd [#allocation8], 4294966768 }
  0x67   :  { %3636 = dma.done.wait [#allocation11], 528  }
  0x68   :  { %3637 = vsyncadd [#allocation11], 4294966768 }
  0x69   :  { %115 = sfence }
  0x6a   :  { %v3805_v0 = vld [vmem:[#allocation6] sm:$0xff]  ;;  %vm122_vm0 = vcmask 261120   ;;  %v3807_v1 = vld [vmem:[#allocation6 + $0x8] sm:$0xff]  ;;  %v175_v16 = vld [vmem:[%s4276_s3 + $0x10] sm:$0xff]  ;;  %s3115_s1 = sld [smem:[#allocation2 + $0x1]]  ;;  %s3648_s16 = smov 96   ;;  %v338_v58 = vlaneseq }
  0x6b   :  { %v123_v2 = vsel %vm122_vm0, %v3805_v0, 0.0  ;;  %v126_v3 = vsel %vm122_vm0, %v3807_v1, 0.0  ;;  %v173_v14 = vld [vmem:[%s4276_s3] sm:$0xff]  ;;  %v174_v15 = vld [vmem:[%s4276_s3 + $0x8] sm:$0xff]  ;;  %v176_v18 = vld [vmem:[%s4276_s3 + $0x18] sm:$0xff]  ;;  %s118_s3 = sld [smem:[#allocation2]] }
  0x6c   :  { %124 = vadd.xlane.f32.xlu0 %v123_v2  ;;  %v3370_v17 = vpack.c.bf16 %v174_v15, %v173_v14  ;;  %v3374_v19 = vpack.c.bf16 %v176_v18, %v175_v16  ;;  %v3118_v48 = vld [vmem:[%s4277_s4] ss:$0 sm:$0xff]  ;;  %s3649_s0 = smov 88   ;;  %s3650_s17 = smov 120   ;;  %v3655_v53 = vmov 0.0   ;;  %vm3656_vm5 = vmmov 0  }
  0x6d   :  { %s3651_s19 = smov 80   ;;  %s3652_s4 = smov 104   ;;  %3259 = vmatprep.subr.mxu0 %v3655_v53  ;;  %3261 = vmatprep.mubr.msk.f32.mxu0 %vm3656_vm5, %v3655_v53  ;;  %v3657_v56 = vmov 1983009808   ;;  %v3658_v61 = vmov 1934713408  }
  0x6e   :  { %3371 = vmatprep.subr.bf16.mxu1 %v3370_v17  ;;  %s3653_s21 = smov 72   ;;  %s3654_s22 = smov 112   ;;  %v336_v57 = vunpack.c.l.s4 %v3657_v56  ;;  %v400_v62 = vunpack.c.l.s4 %v3658_v61  ;;  %vm1149_vm6 = vcmask 64512   ;;  %vm2752_vm7 = vcmask 130048  }
  0x6f   :  { %3373 = vmatpush3.bf16.msra.mxu1 %v3370_v17  ;;  %s3659_s14 = smov 56   ;;  %s3660_s7 = smov 48   ;;  %vm2755_vm8 = vcmask 195584   ;;  %vm3009_vm13 = vcmask 523264  }
  0x70   :  { %127 = vadd.xlane.f32.xlu0 %v126_v3  ;;  %3375 = vmatprep.subr.bf16.mxu1 %v3374_v19  ;;  %v170_v41 = vstv %s3115_s1  ;;  %v337_v63 = vunpack.c.0.s8 %v336_v57  ;;  %v401_v3 = vunpack.c.0.s8 %v400_v62  ;;  %s3116_s26 = sld [smem:[#allocation2 + $0x2]]  ;;  %s3117_s27 = sld [smem:[#allocation2 + $0x3]] }
  0x71   :  { %v167_v38 = vstv %s118_s3  ;;  %s3661_s3 = smov 64  }
  0x73   :  { %3377 = vmatpush3.bf16.msra.mxu1 %v3374_v19 }
  0x74   :  { %3249 = vmatprep.subr.mxu1 %v3655_v53 }
  0xf9   :  { %v125_v4 = vpop.xlane.xlu0 %124 }
  0xfa   :  { %v130_v5 = vmul.f32 0.03125, %v125_v4 }
  0xfc   :  { %v132_v6 = vsub.f32 %v3805_v0, %v130_v5 }
  0xfd   :  { %v128_v7 = vpop.xlane.xlu0 %127 }
  0xfe   :  { %v131_v8 = vmul.f32 0.03125, %v128_v7  ;;  %v134_v9 = vmul.f32 %v132_v6, %v132_v6 }
 0x100   :  { %v133_v10 = vsub.f32 %v3807_v1, %v131_v8  ;;  %v136_v11 = vsel %vm122_vm0, %v134_v9, 0.0 }
 0x101   :  { %137 = vadd.xlane.f32.xlu1 %v136_v11 }
 0x102   :  { %v135_v12 = vmul.f32 %v133_v10, %v133_v10 }
 0x104   :  { %v139_v13 = vsel %vm122_vm0, %v135_v12, 0.0 }
 0x105   :  { %140 = vadd.xlane.f32.xlu1 %v139_v13 }
 0x18e   :  { %v138_v20 = vpop.xlane.xlu1 %137 }
 0x18f   :  { %v143_v21 = vmul.f32 0.032258064, %v138_v20 }
 0x191   :  { %3436 = vrsqrt.f32 %v143_v21  ;;  %vm147_vm1 = vcmp.eq.f32.partialorder %v143_v21, inf  ;;  %v150_v26 = vand.u32 2147483648, %v143_v21  ;;  %vm149_vm2 = vcmp.eq.f32.partialorder %v143_v21, 0.0 }
 0x192   :  { %v141_v22 = vpop.xlane.xlu1 %140 }
 0x193   :  { %v144_v23 = vmul.f32 0.032258064, %v141_v22 }
 0x195   :  { %3438 = vrsqrt.f32 %v144_v23  ;;  %vm154_vm3 = vcmp.eq.f32.partialorder %v144_v23, inf  ;;  %v157_v32 = vand.u32 2147483648, %v144_v23  ;;  %vm156_vm4 = vcmp.eq.f32.partialorder %v144_v23, 0.0 }
 0x19b   :  { %v3437_v24 = vpop.eup %3436 }
 0x19c   :  { %v146_v25 = vmul.f32 %v3437_v24, %v143_v21 }
 0x19e   :  { %v148_v27 = vsel %vm147_vm1, %v143_v21, %v146_v25 }
 0x19f   :  { %v3439_v28 = vpop.eup %3438  ;;  %v151_v29 = vsel %vm149_vm2, %v150_v26, %v148_v27 }
 0x1a0   :  { %v153_v30 = vmul.f32 %v3439_v28, %v144_v23  ;;  %v159_v31 = vadd.f32 1e-06, %v151_v29 }
 0x1a2   :  { %v155_v33 = vsel %vm154_vm3, %v144_v23, %v153_v30  ;;  %3440 = vrcp.f32 %v159_v31 }
 0x1a3   :  { %v158_v34 = vsel %vm156_vm4, %v157_v32, %v155_v33 }
 0x1a4   :  { %v160_v35 = vadd.f32 1e-06, %v158_v34 }
 0x1a6   :  { %3442 = vrcp.f32 %v160_v35 }
 0x1ac   :  { %v3441_v36 = vpop.eup %3440 }
 0x1ad   :  { %v162_v37 = vmul.f32 %v3441_v36, %v130_v5 }
 0x1af   :  { %v165_v39 = vsub.f32 %v3805_v0, %v162_v37  ;;  %v339_v0 = vshrl.u32 %v338_v58, 7 }
 0x1b0   :  { %v3443_v40 = vpop.eup %3442 }
 0x1b1   :  { %v164_v42 = vmul.f32 %v3443_v40, %v131_v8  ;;  %v168_v43 = vmul.f32 %v167_v38, %v165_v39  ;;  %v3862_v4 = vsub.s32 %v337_v63, %v339_v0  ;;  %v3864_v13 = vsub.s32 %v401_v3, %v339_v0 }
 0x1b3   :  { %v166_v44 = vsub.f32 %v3807_v1, %v164_v42  ;;  %v171_v45 = vadd.f32 %v170_v41, %v168_v43 }
 0x1b5   :  { %v169_v46 = vmul.f32 %v167_v38, %v166_v44  ;;  %3246 = vmatprep.mubr.msk.f32.mxu1 %vm122_vm0, %v171_v45 }
 0x1b7   :  { %v172_v47 = vadd.f32 %v170_v41, %v169_v46 }
 0x1b9   :  { %3247 = vmatmul.mubr.msk.f32.vlgmr.msra.gmra.mrb[0].mxu1 %vm122_vm0, %v172_v47 }
 0x1ba   :  { %3251 = vmatprep.mubr.msk.f32.mxu1 %vm3656_vm5, %v3655_v53 }
 0x28c   :  { %v3248_v49 = vpop.f32.mrb[0].mxu1 }
 0x28d   :  { %v3836_v50 = vadd.f32 %v3248_v49, %v3118_v48  ;;  %v256_v51 = vpop.f32.mrb[1].mxu1 }
 0x28e   :  { %v3838_v52 = vadd.f32 %v3118_v48, %v256_v51 }
 0x28f   :  { %287 = vrot.lane.b32.xlu1 %v3836_v50, %s3648_s16 }
 0x290   :  { %285 = vrot.lane.b32.xlu0 %v3838_v52, %s3648_s16 }
 0x293   :  { %291 = vrot.lane.b32.xlu1 %v3838_v52, %s3649_s0 }
 0x294   :  { %267 = vrot.lane.b32.xlu0 %v3838_v52, %s3650_s17 }
 0x297   :  { %297 = vrot.lane.b32.xlu1 %v3838_v52, %s3651_s19 }
 0x298   :  { %279 = vrot.lane.b32.xlu0 %v3838_v52, %s3652_s4 }
 0x29b   :  { %303 = vrot.lane.b32.xlu1 %v3838_v52, %s3653_s21 }
 0x29c   :  { %293 = vrot.lane.b32.xlu0 %v3836_v50, %s3649_s0  ;;  %s3662_s0 = smov 40  }
 0x29f   :  { %273 = vrot.lane.b32.xlu1 %v3838_v52, %s3654_s22 }
 0x2a0   :  { %305 = vrot.lane.b32.xlu0 %v3836_v50, %s3653_s21 }
 0x2a3   :  { %299 = vrot.lane.b32.xlu1 %v3836_v50, %s3651_s19 }
 0x2a4   :  { %275 = vrot.lane.b32.xlu0 %v3836_v50, %s3654_s22 }
 0x2a7   :  { %269 = vrot.lane.b32.xlu1 %v3836_v50, %s3650_s17  ;;  %s3664_s17 = smov 24  }
 0x2ab   :  { %281 = vrot.lane.b32.xlu1 %v3836_v50, %s3652_s4 }
 0x301   :  { %v3860_v54 = vpop.permute.xlu1 %287 }
 0x302   :  { %v286_v55 = vpop.permute.xlu0 %285 }
 0x305   :  { %v292_v59 = vpop.permute.xlu1 %291 }
 0x306   :  { %v268_v60 = vpop.permute.xlu0 %267 }
 0x309   :  { %v298_v1 = vpop.permute.xlu1 %297 }
 0x30a   :  { %v280_v2 = vpop.permute.xlu0 %279  ;;  %v365_v5 = vcombine.low %v286_v55, %v298_v1  ;;  %v366_v6 = vcombine.high %v286_v55, %v298_v1 }
 0x30b   :  { %v349_v7 = vcombine.low %v268_v60, %v280_v2  ;;  %v350_v8 = vcombine.high %v268_v60, %v280_v2 }
 0x30c   :  { %v373_v14 = vrot.slane %v365_v5, %v3862_v4  ;;  %v380_v15 = vrot.slane %v366_v6, %v3862_v4 }
 0x30d   :  { %v304_v9 = vpop.permute.xlu1 %303  ;;  %v357_v18 = vrot.slane %v349_v7, %v3862_v4  ;;  %v364_v19 = vrot.slane %v350_v8, %v3862_v4 }
 0x30e   :  { %v381_v10 = vcombine.low %v292_v59, %v304_v9  ;;  %v382_v11 = vcombine.high %v292_v59, %v304_v9  ;;  %v294_v12 = vpop.permute.xlu0 %293 }
 0x310   :  { %v389_v16 = vrot.slane %v381_v10, %v3862_v4  ;;  %v396_v17 = vrot.slane %v382_v11, %v3862_v4 }
 0x311   :  { %v274_v20 = vpop.permute.xlu1 %273 }
 0x312   :  { %v429_v21 = vcombine.low %v373_v14, %v389_v16  ;;  %v430_v22 = vcombine.high %v373_v14, %v389_v16  ;;  %v445_v23 = vcombine.low %v380_v15, %v396_v17  ;;  %v446_v24 = vcombine.high %v380_v15, %v396_v17  ;;  %v306_v25 = vpop.permute.xlu0 %305 }
 0x313   :  { %v333_v26 = vcombine.low %v3838_v52, %v274_v20  ;;  %v334_v27 = vcombine.high %v3838_v52, %v274_v20  ;;  %v585_v28 = vcombine.low %v294_v12, %v306_v25  ;;  %v586_v29 = vcombine.high %v294_v12, %v306_v25 }
 0x314   :  { %v437_v30 = vrot.slane %v429_v21, %v3864_v13  ;;  %v444_v31 = vrot.slane %v430_v22, %v3864_v13  ;;  %v453_v32 = vrot.slane %v445_v23, %v3864_v13  ;;  %v460_v33 = vrot.slane %v446_v24, %v3864_v13 }
 0x315   :  { %v341_v34 = vrot.slane %v333_v26, %v3862_v4  ;;  %v348_v35 = vrot.slane %v334_v27, %v3862_v4  ;;  %v593_v36 = vrot.slane %v585_v28, %v3862_v4  ;;  %v600_v37 = vrot.slane %v586_v29, %v3862_v4  ;;  %v300_v38 = vpop.permute.xlu1 %299 }
 0x316   :  { %v3122_v39 = vcombine.low %v437_v30, %v444_v31  ;;  %v3124_v40 = vcombine.high %v437_v30, %v444_v31  ;;  %v3126_v41 = vcombine.low %v453_v32, %v460_v33  ;;  %v3128_v42 = vcombine.high %v453_v32, %v460_v33  ;;  %v276_v59 = vpop.permute.xlu0 %275 }
 0x317   :  { %v397_v43 = vcombine.low %v341_v34, %v357_v18  ;;  %v398_v44 = vcombine.high %v341_v34, %v357_v18  ;;  %v413_v45 = vcombine.low %v348_v35, %v364_v19  ;;  %v414_v46 = vcombine.high %v348_v35, %v364_v19 }
 0x318   :  { %v3883_v47 = vrot.slane %v3122_v39, %v3862_v4  ;;  %v3886_v48 = vrot.slane %v3124_v40, %v3862_v4  ;;  %v3889_v49 = vrot.slane %v3126_v41, %v3862_v4  ;;  %v3892_v51 = vrot.slane %v3128_v42, %v3862_v4 }
 0x319   :  { %v405_v55 = vrot.slane %v397_v43, %v3864_v13  ;;  %v412_v56 = vrot.slane %v398_v44, %v3864_v13  ;;  %v421_v57 = vrot.slane %v413_v45, %v3864_v13  ;;  %v428_v58 = vrot.slane %v414_v46, %v3864_v13  ;;  %v270_v60 = vpop.permute.xlu1 %269 }
 0x31a   :  { %v821_v61 = vcombine.low %v3883_v47, %v3886_v48  ;;  %v853_v62 = vcombine.low %v3889_v49, %v3892_v51  ;;  %v569_v63 = vcombine.low %v3860_v54, %v300_v38  ;;  %v570_v0 = vcombine.high %v3860_v54, %v300_v38 }
 0x31b   :  { %v3121_v1 = vcombine.low %v405_v55, %v412_v56  ;;  %v3123_v2 = vcombine.high %v405_v55, %v412_v56  ;;  %v3125_v3 = vcombine.low %v421_v57, %v428_v58  ;;  %v3127_v5 = vcombine.high %v421_v57, %v428_v58 }
 0x31c   :  { %v577_v6 = vrot.slane %v569_v63, %v3862_v4  ;;  %v584_v7 = vrot.slane %v570_v0, %v3862_v4  ;;  %v537_v8 = vcombine.low %v3836_v50, %v276_v59  ;;  %v538_v9 = vcombine.high %v3836_v50, %v276_v59 }
 0x31d   :  { %v3909_v10 = vrot.slane %v3121_v1, %v3862_v4  ;;  %v3912_v11 = vrot.slane %v3123_v2, %v3862_v4  ;;  %v3915_v54 = vrot.slane %v3125_v3, %v3862_v4  ;;  %v3918_v12 = vrot.slane %v3127_v5, %v3862_v4  ;;  %v282_v18 = vpop.permute.xlu1 %281 }
 0x31e   :  { %v633_v14 = vcombine.low %v577_v6, %v593_v36  ;;  %v634_v15 = vcombine.high %v577_v6, %v593_v36  ;;  %v649_v16 = vcombine.low %v584_v7, %v600_v37  ;;  %v650_v17 = vcombine.high %v584_v7, %v600_v37 }
 0x31f   :  { %v805_v19 = vcombine.low %v3909_v10, %v3912_v11  ;;  %v837_v20 = vcombine.low %v3915_v54, %v3918_v12  ;;  %v545_v21 = vrot.slane %v537_v8, %v3862_v4  ;;  %v552_v22 = vrot.slane %v538_v9, %v3862_v4 }
 0x320   :  { %v641_v23 = vrot.slane %v633_v14, %v3864_v13  ;;  %v648_v24 = vrot.slane %v634_v15, %v3864_v13  ;;  %v657_v25 = vrot.slane %v649_v16, %v3864_v13  ;;  %v664_v26 = vrot.slane %v650_v17, %v3864_v13 }
 0x321   :  { %v553_v27 = vcombine.low %v270_v60, %v282_v18  ;;  %v554_v28 = vcombine.high %v270_v60, %v282_v18  ;;  %v829_v29 = vrot.slane %v821_v61, %v3864_v13  ;;  %v861_v30 = vrot.slane %v853_v62, %v3864_v13 }
 0x322   :  { %v3132_v31 = vcombine.low %v641_v23, %v648_v24  ;;  %v3134_v32 = vcombine.high %v641_v23, %v648_v24  ;;  %v3136_v33 = vcombine.low %v657_v25, %v664_v26  ;;  %v3138_v34 = vcombine.high %v657_v25, %v664_v26 }
 0x323   :  { %v561_v35 = vrot.slane %v553_v27, %v3862_v4  ;;  %v568_v36 = vrot.slane %v554_v28, %v3862_v4  ;;  %v873_v37 = vcombine.low %v829_v29, %v861_v30  ;;  %v822_v38 = vcombine.high %v3883_v47, %v3886_v48 }
 0x324   :  { %v960_v39 = vrot.slane %v3132_v31, %v3862_v4  ;;  %v976_v40 = vrot.slane %v3134_v32, %v3862_v4  ;;  %v992_v41 = vrot.slane %v3136_v33, %v3862_v4  ;;  %v1008_v42 = vrot.slane %v3138_v34, %v3862_v4 }
 0x325   :  { %v601_v43 = vcombine.low %v545_v21, %v561_v35  ;;  %v602_v44 = vcombine.high %v545_v21, %v561_v35  ;;  %v617_v45 = vcombine.low %v552_v22, %v568_v36  ;;  %v618_v46 = vcombine.high %v552_v22, %v568_v36  ;;  %3250 = vmatpush3.xpose.msk.msra.mxu1 %vm1149_vm6, %v873_v37 }
 0x326   :  { %v1025_v55 = vcombine.low %v960_v39, %v976_v40  ;;  %v1057_v56 = vcombine.low %v992_v41, %v1008_v42  ;;  %3254 = vmatprep.subr.mxu1 %v3655_v53  ;;  %v836_v59 = vrot.slane %v822_v38, %v3864_v13  ;;  %v854_v60 = vcombine.high %v3889_v49, %v3892_v51 }
 0x327   :  { %v609_v47 = vrot.slane %v601_v43, %v3864_v13  ;;  %v616_v48 = vrot.slane %v602_v44, %v3864_v13  ;;  %v625_v57 = vrot.slane %v617_v45, %v3864_v13  ;;  %v632_v58 = vrot.slane %v618_v46, %v3864_v13  ;;  %v1767_v46 = vld [vmem:[%s4275_s2 + $0x8] sm:$0xff] }
 0x328   :  { %v813_v61 = vrot.slane %v805_v19, %v3864_v13  ;;  %v845_v62 = vrot.slane %v837_v20, %v3864_v13  ;;  %v868_v3 = vrot.slane %v854_v60, %v3864_v13  ;;  %v874_v6 = vcombine.high %v829_v29, %v861_v30 }
 0x329   :  { %v3131_v63 = vcombine.low %v609_v47, %v616_v48  ;;  %v3133_v0 = vcombine.high %v609_v47, %v616_v48  ;;  %v3135_v1 = vcombine.low %v625_v57, %v632_v58  ;;  %v3137_v2 = vcombine.high %v625_v57, %v632_v58  ;;  %v1768_v57 = vld [vmem:[%s4275_s2 + $0x10] sm:$0xff] }
 0x32a   :  { %v869_v5 = vcombine.low %v813_v61, %v845_v62  ;;  %v806_v7 = vcombine.high %v3909_v10, %v3912_v11  ;;  %v1026_v14 = vcombine.high %v960_v39, %v976_v40  ;;  %v875_v15 = vcombine.low %v836_v59, %v868_v3 }
 0x32b   :  { %v953_v8 = vrot.slane %v3131_v63, %v3862_v4  ;;  %v969_v9 = vrot.slane %v3133_v0, %v3862_v4  ;;  %v985_v49 = vrot.slane %v3135_v1, %v3862_v4  ;;  %v1001_v51 = vrot.slane %v3137_v2, %v3862_v4  ;;  %v1770_v2 = vld [vmem:[%s4275_s2 + $0x20] sm:$0xff] }
 0x32c   :  { %3252 = vmatmul.mubr.msk.f32.vlgmr.msra.gmra.mrb[2].mxu1 %vm1149_vm6, %v869_v5  ;;  %v820_v16 = vrot.slane %v806_v7, %v3864_v13  ;;  %v838_v17 = vcombine.high %v3915_v54, %v3918_v12  ;;  %v1058_v18 = vcombine.high %v992_v41, %v1008_v42  ;;  %v876_v11 = vcombine.high %v836_v59, %v868_v3  ;;  %v1766_v41 = vld [vmem:[%s4275_s2] sm:$0xff] }
 0x32d   :  { %v1009_v19 = vcombine.low %v953_v8, %v969_v9  ;;  %v1041_v10 = vcombine.low %v985_v49, %v1001_v51  ;;  %3255 = vmatpush3.xpose.msk.msra.mxu1 %vm1149_vm6, %v874_v6  ;;  %3260 = vmatpush3.xpose.msk.msra.mxu0 %vm1149_vm6, %v875_v15  ;;  %v870_v21 = vcombine.high %v813_v61, %v845_v62 }
 0x32e   :  { %v852_v20 = vrot.slane %v838_v17, %v3864_v13  ;;  %3256 = vmatprep.mubr.msk.f32.mxu1 %vm3656_vm5, %v3655_v53  ;;  %v1033_v22 = vrot.slane %v1025_v55, %v3864_v13  ;;  %3264 = vmatprep.subr.mxu1 %v3655_v53  ;;  %v1065_v54 = vrot.slane %v1057_v56, %v3864_v13 }
 0x32f   :  { %3269 = vmatprep.subr.mxu0 %v3655_v53  ;;  %v1017_v12 = vrot.slane %v1009_v19, %v3864_v13  ;;  %v1049_v23 = vrot.slane %v1041_v10, %v3864_v13  ;;  %v1010_v24 = vcombine.high %v953_v8, %v969_v9  ;;  %v1042_v25 = vcombine.high %v985_v49, %v1001_v51  ;;  %v1769_v9 = vld [vmem:[%s4275_s2 + $0x18] sm:$0xff]  ;;  %v1772_v10 = vld [vmem:[%s4275_s2 + $0x30] sm:$0xff] }
 0x330   :  { %v871_v26 = vcombine.low %v820_v16, %v852_v20  ;;  %3257 = vmatmul.mubr.msk.f32.vlgmr.msra.gmra.mrb[4].mxu1 %vm1149_vm6, %v870_v21  ;;  %v1077_v27 = vcombine.low %v1033_v22, %v1065_v54  ;;  %v1040_v28 = vrot.slane %v1026_v14, %v3864_v13  ;;  %v1072_v29 = vrot.slane %v1058_v18, %v3864_v13 }
 0x331   :  { %3265 = vmatpush3.xpose.msk.msra.mxu1 %vm1149_vm6, %v876_v11  ;;  %3266 = vmatprep.mubr.msk.f32.mxu1 %vm3656_vm5, %v3655_v53  ;;  %v872_v30 = vcombine.high %v820_v16, %v852_v20  ;;  %v1073_v31 = vcombine.low %v1017_v12, %v1049_v23  ;;  %v1078_v32 = vcombine.high %v1033_v22, %v1065_v54 }
 0x332   :  { %3262 = vmatmul.mubr.msk.f32.vlgmr.msra.gmra.mrb[0].mxu0 %vm1149_vm6, %v871_v26  ;;  %3274 = vmatprep.subr.mxu1 %v3655_v53  ;;  %v1074_v33 = vcombine.high %v1017_v12, %v1049_v23  ;;  %v1024_v34 = vrot.slane %v1010_v24, %v3864_v13  ;;  %v1056_v35 = vrot.slane %v1042_v25, %v3864_v13  ;;  %v1771_v12 = vld [vmem:[%s4275_s2 + $0x28] sm:$0xff]  ;;  %v1773_v25 = vld [vmem:[%s4275_s2 + $0x38] sm:$0xff]  ;;  %s3663_s2 = smov 16  }
 0x333   :  { %3270 = vmatpush3.xpose.msk.msra.mxu0 %vm1149_vm6, %v1077_v27  ;;  %3271 = vmatprep.mubr.msk.f32.mxu0 %vm3656_vm5, %v3655_v53  ;;  %v1079_v36 = vcombine.low %v1040_v28, %v1072_v29  ;;  %v1080_v37 = vcombine.high %v1040_v28, %v1072_v29 }
 0x334   :  { %3267 = vmatmul.mubr.msk.f32.vlgmr.msra.gmra.mrb[6].mxu1 %vm1149_vm6, %v872_v30  ;;  %3279 = vmatprep.subr.mxu0 %v3655_v53  ;;  %v1075_v38 = vcombine.low %v1024_v34, %v1056_v35  ;;  %v1076_v39 = vcombine.high %v1024_v34, %v1056_v35 }
 0x335   :  { %3275 = vmatpush3.xpose.msk.msra.mxu1 %vm1149_vm6, %v1078_v32  ;;  %3276 = vmatprep.mubr.msk.f32.mxu1 %vm3656_vm5, %v3655_v53 }
 0x336   :  { %3284 = vmatprep.subr.mxu1 %v3655_v53  ;;  %3272 = vmatmul.mubr.msk.f32.vlgmr.msra.gmra.mrb[2].mxu0 %vm1149_vm6, %v1073_v31 }
 0x337   :  { %3280 = vmatpush3.xpose.msk.msra.mxu0 %vm1149_vm6, %v1079_v36  ;;  %3281 = vmatprep.mubr.msk.f32.mxu0 %vm3656_vm5, %v3655_v53 }
 0x338   :  { %3277 = vmatmul.mubr.msk.f32.vlgmr.msra.gmra.mrb[8].mxu1 %vm1149_vm6, %v1074_v33  ;;  %3289 = vmatprep.subr.mxu0 %v3655_v53 }
 0x339   :  { %3285 = vmatpush3.xpose.msk.msra.mxu1 %vm1149_vm6, %v1080_v37  ;;  %3286 = vmatprep.mubr.msk.f32.mxu1 %vm3656_vm5, %v3655_v53 }
 0x33a   :  { %3282 = vmatmul.mubr.msk.f32.vlgmr.msra.gmra.mrb[4].mxu0 %vm1149_vm6, %v1075_v38  ;;  %3294 = vmatprep.subr.mxu1 %v3655_v53 }
 0x33b   :  { %3291 = vmatprep.mubr.msk.f32.mxu0 %vm3656_vm5, %v3655_v53 }
 0x33c   :  { %3287 = vmatmul.mubr.msk.f32.vlgmr.msra.gmra.mrb[10].mxu1 %vm1149_vm6, %v1076_v39 }
 0x33d   :  { %3296 = vmatprep.mubr.msk.f32.mxu1 %vm3656_vm5, %v3655_v53 }
 0x3ff   :  { %v1222_v40 = vpop.f32.mrb[2].mxu1 }
 0x400   :  { %v1758_v42 = vmul.f32 0.35355338, %v1222_v40  ;;  %v3253_v43 = vpop.f32.mrb[3].mxu1 }
 0x402   :  { %v1774_v44 = vadd.f32 %v1766_v41, %v1758_v42 }
 0x403   :  { %v1298_v45 = vpop.f32.mrb[4].mxu1 }
 0x404   :  { %v1759_v55 = vmul.f32 0.35355338, %v1298_v45  ;;  %v3258_v56 = vpop.f32.mrb[5].mxu1  ;;  %v1782_v47 = vsel %vm1149_vm6, %v1774_v44, -inf }
 0x405   :  { %v1374_v48 = vpop.f32.mrb[0].mxu0  ;;  %1783 = vmax.xlane.f32.xlu0 %v1782_v47 }
 0x406   :  { %v1760_v58 = vmul.f32 0.35355338, %v1374_v48  ;;  %v3263_v59 = vpop.f32.mrb[1].mxu0  ;;  %v1775_v60 = vadd.f32 %v1767_v46, %v1759_v55 }
 0x407   :  { %v1450_v61 = vpop.f32.mrb[6].mxu1 }
 0x408   :  { %v3268_v62 = vpop.f32.mrb[7].mxu1  ;;  %v1776_v63 = vadd.f32 %v1768_v57, %v1760_v58  ;;  %v1785_v0 = vsel %vm1149_vm6, %v1775_v60, -inf  ;;  %v1761_v3 = vmul.f32 0.35355338, %v1450_v61 }
 0x409   :  { %1786 = vmax.xlane.f32.xlu1 %v1785_v0  ;;  %v1526_v1 = vpop.f32.mrb[2].mxu0 }
 0x40a   :  { %v1788_v5 = vsel %vm1149_vm6, %v1776_v63, -inf  ;;  %v1762_v6 = vmul.f32 0.35355338, %v1526_v1  ;;  %v3273_v7 = vpop.f32.mrb[3].mxu0  ;;  %v1777_v18 = vadd.f32 %v1769_v9, %v1761_v3 }
 0x40b   :  { %1789 = vmax.xlane.f32.xlu0 %v1788_v5  ;;  %v1602_v8 = vpop.f32.mrb[8].mxu1 }
 0x40c   :  { %v3278_v49 = vpop.f32.mrb[9].mxu1  ;;  %v1778_v51 = vadd.f32 %v1770_v2, %v1762_v6  ;;  %v1791_v20 = vsel %vm1149_vm6, %v1777_v18, -inf  ;;  %v1763_v54 = vmul.f32 0.35355338, %v1602_v8 }
 0x40d   :  { %v1678_v14 = vpop.f32.mrb[4].mxu0 }
 0x40e   :  { %v1764_v15 = vmul.f32 0.35355338, %v1678_v14  ;;  %v3283_v16 = vpop.f32.mrb[5].mxu0  ;;  %v1794_v17 = vsel %vm1149_vm6, %v1778_v51, -inf  ;;  %v1779_v24 = vadd.f32 %v1771_v12, %v1763_v54 }
 0x40f   :  { %v1754_v19 = vpop.f32.mrb[10].mxu1  ;;  %1795 = vmax.xlane.f32.xlu0 %v1794_v17 }
 0x410   :  { %v3288_v11 = vpop.f32.mrb[11].mxu1  ;;  %v1780_v21 = vadd.f32 %v1772_v10, %v1764_v15  ;;  %v1765_v23 = vmul.f32 0.35355338, %v1754_v19  ;;  %v1797_v26 = vsel %vm1149_vm6, %v1779_v24, -inf }
 0x412   :  { %v1800_v22 = vsel %vm1149_vm6, %v1780_v21, -inf  ;;  %v1781_v27 = vadd.f32 %v1773_v25, %v1765_v23 }
 0x413   :  { %1792 = vmax.xlane.f32.xlu0 %v1791_v20 }
 0x414   :  { %v1803_v28 = vsel %vm1149_vm6, %v1781_v27, -inf }
 0x417   :  { %1801 = vmax.xlane.f32.xlu0 %v1800_v22 }
 0x41a   :  { %315 = vrot.lane.b32.xlu1 %v3838_v52, %s3659_s14 }
 0x41e   :  { %321 = vrot.lane.b32.xlu1 %v3838_v52, %s3660_s7 }
 0x42d   :  { %309 = vrot.lane.b32.xlu0 %v3838_v52, %s3661_s3 }
 0x442   :  { %1798 = vmax.xlane.f32.xlu1 %v1797_v26 }
 0x446   :  { %1804 = vmax.xlane.f32.xlu1 %v1803_v28 }
 0x457   :  { %327 = vrot.lane.b32.xlu1 %v3838_v52, %s3662_s0 }
 0x492   :  { %v1784_v29 = vpop.xlane.xlu0 %1783 }
 0x493   :  { %v1806_v30 = vsub.f32 %v1774_v44, %v1784_v29 }
 0x495   :  { %v1814_v31 = vmul.f32 1.442695, %v1806_v30 }
 0x496   :  { %v1787_v32 = vpop.xlane.xlu1 %1786 }
 0x497   :  { %3444 = vpow2.f32 %v1814_v31  ;;  %v1807_v33 = vsub.f32 %v1775_v60, %v1787_v32 }
 0x498   :  { %v1790_v34 = vpop.xlane.xlu0 %1789 }
 0x499   :  { %v1816_v35 = vmul.f32 1.442695, %v1807_v33  ;;  %v1808_v36 = vsub.f32 %v1776_v63, %v1790_v34 }
 0x49a   :  { %v316_v0 = vpop.permute.xlu1 %315 }
 0x49b   :  { %3446 = vpow2.f32 %v1816_v35  ;;  %v1818_v37 = vmul.f32 1.442695, %v1808_v36 }
 0x49c   :  { %v1796_v38 = vpop.xlane.xlu0 %1795 }
 0x49d   :  { %3448 = vpow2.f32 %v1818_v37  ;;  %v1810_v39 = vsub.f32 %v1778_v51, %v1796_v38 }
 0x49e   :  { %v322_v1 = vpop.permute.xlu1 %321 }
 0x49f   :  { %v1822_v40 = vmul.f32 1.442695, %v1810_v39 }
 0x4a0   :  { %v1793_v41 = vpop.xlane.xlu0 %1792 }
 0x4a1   :  { %v4048_v42 = vpop.eup %3444  ;;  %3450 = vpow2.f32 %v1822_v40  ;;  %v1809_v52 = vsub.f32 %v1777_v18, %v1793_v41 }
 0x4a2   :  { %v1830_v43 = vsel %vm1149_vm6, %v4048_v42, 0.0 }
 0x4a3   :  { %v1820_v44 = vmul.f32 1.442695, %v1809_v52  ;;  %1831 = vadd.xlane.f32.xlu0 %v1830_v43 }
 0x4a4   :  { %v1802_v45 = vpop.xlane.xlu0 %1801 }
 0x4a5   :  { %v4052_v46 = vpop.eup %3446  ;;  %3452 = vpow2.f32 %v1820_v44  ;;  %v1812_v55 = vsub.f32 %v1780_v21, %v1802_v45 }
 0x4a6   :  { %v1833_v56 = vsel %vm1149_vm6, %v4052_v46, 0.0 }
 0x4a7   :  { %v4056_v47 = vpop.eup %3448  ;;  %v1826_v48 = vmul.f32 1.442695, %v1812_v55  ;;  %1834 = vadd.xlane.f32.xlu1 %v1833_v56 }
 0x4a8   :  { %v1836_v57 = vsel %vm1149_vm6, %v4056_v47, 0.0  ;;  %v310_v6 = vpop.permute.xlu0 %309 }
 0x4a9   :  { %3454 = vpow2.f32 %v1826_v48  ;;  %1837 = vadd.xlane.f32.xlu0 %v1836_v57  ;;  %v469_v9 = vcombine.low %v310_v6, %v322_v1  ;;  %v470_v49 = vcombine.high %v310_v6, %v322_v1 }
 0x4ab   :  { %v4060_v58 = vpop.eup %3450  ;;  %v477_v17 = vrot.slane %v469_v9, %v3862_v4  ;;  %v484_v18 = vrot.slane %v470_v49, %v3862_v4 }
 0x4ac   :  { %v1842_v59 = vsel %vm1149_vm6, %v4060_v58, 0.0 }
 0x4ad   :  { %1843 = vadd.xlane.f32.xlu0 %v1842_v59 }
 0x4af   :  { %v4064_v60 = vpop.eup %3452 }
 0x4b0   :  { %v1839_v61 = vsel %vm1149_vm6, %v4064_v60, 0.0 }
 0x4b1   :  { %1840 = vadd.xlane.f32.xlu1 %v1839_v61 }
 0x4b3   :  { %v4068_v62 = vpop.eup %3454 }
 0x4b4   :  { %v1848_v63 = vsel %vm1149_vm6, %v4068_v62, 0.0 }
 0x4b5   :  { %1849 = vadd.xlane.f32.xlu0 %v1848_v63 }
 0x4cf   :  { %v1799_v2 = vpop.xlane.xlu1 %1798 }
 0x4d0   :  { %v1811_v3 = vsub.f32 %v1779_v24, %v1799_v2 }
 0x4d2   :  { %v1824_v5 = vmul.f32 1.442695, %v1811_v3 }
 0x4d3   :  { %v1805_v7 = vpop.xlane.xlu1 %1804 }
 0x4d4   :  { %3456 = vpow2.f32 %v1824_v5  ;;  %v1813_v8 = vsub.f32 %v1781_v27, %v1805_v7 }
 0x4d6   :  { %v1828_v51 = vmul.f32 1.442695, %v1813_v8 }
 0x4d7   :  { %v328_v14 = vpop.permute.xlu1 %327 }
 0x4d8   :  { %3458 = vpow2.f32 %v1828_v51  ;;  %v485_v15 = vcombine.low %v316_v0, %v328_v14  ;;  %v486_v16 = vcombine.high %v316_v0, %v328_v14 }
 0x4da   :  { %v493_v19 = vrot.slane %v485_v15, %v3862_v4  ;;  %v500_v10 = vrot.slane %v486_v16, %v3862_v4 }
 0x4dc   :  { %v501_v11 = vcombine.low %v477_v17, %v493_v19  ;;  %v502_v20 = vcombine.high %v477_v17, %v493_v19  ;;  %v517_v21 = vcombine.low %v484_v18, %v500_v10  ;;  %v518_v22 = vcombine.high %v484_v18, %v500_v10 }
 0x4de   :  { %v4076_v54 = vpop.eup %3456  ;;  %v509_v12 = vrot.slane %v501_v11, %v3864_v13  ;;  %v516_v23 = vrot.slane %v502_v20, %v3864_v13  ;;  %v525_v24 = vrot.slane %v517_v21, %v3864_v13  ;;  %v532_v25 = vrot.slane %v518_v22, %v3864_v13 }
 0x4df   :  { %v1845_v26 = vsel %vm1149_vm6, %v4076_v54, 0.0 }
 0x4e0   :  { %v877_v27 = vcombine.low %v509_v12, %v516_v23  ;;  %v3129_v28 = vcombine.high %v509_v12, %v516_v23  ;;  %v893_v29 = vcombine.low %v525_v24, %v532_v25  ;;  %v3130_v30 = vcombine.high %v525_v24, %v532_v25  ;;  %1846 = vadd.xlane.f32.xlu1 %v1845_v26 }
 0x4e2   :  { %v4084_v31 = vpop.eup %3458  ;;  %v884_v32 = vrot.slane %v877_v27, %v3862_v4  ;;  %v892_v33 = vrot.slane %v3129_v28, %v3862_v4  ;;  %v900_v34 = vrot.slane %v893_v29, %v3862_v4  ;;  %v908_v35 = vrot.slane %v3130_v30, %v3862_v4 }
 0x4e3   :  { %v1851_v36 = vsel %vm1149_vm6, %v4084_v31, 0.0 }
 0x4e4   :  { %1852 = vadd.xlane.f32.xlu0 %v1851_v36  ;;  %v909_v37 = vcombine.low %v884_v32, %v892_v33  ;;  %v925_v38 = vcombine.low %v900_v34, %v908_v35  ;;  %v910_v39 = vcombine.high %v884_v32, %v892_v33  ;;  %v926_v40 = vcombine.high %v900_v34, %v908_v35 }
 0x4e6   :  { %v917_v41 = vrot.slane %v909_v37, %v3864_v13  ;;  %v933_v52 = vrot.slane %v925_v38, %v3864_v13  ;;  %v924_v43 = vrot.slane %v910_v39, %v3864_v13  ;;  %v940_v44 = vrot.slane %v926_v40, %v3864_v13 }
 0x4e8   :  { %v941_v45 = vcombine.low %v917_v41, %v933_v52  ;;  %v942_v55 = vcombine.high %v917_v41, %v933_v52  ;;  %v943_v56 = vcombine.low %v924_v43, %v940_v44  ;;  %v944_v48 = vcombine.high %v924_v43, %v940_v44 }
 0x4ea   :  { %3290 = vmatpush3.msra.mxu0 %v941_v45  ;;  %3295 = vmatpush3.msra.mxu1 %v942_v55 }
 0x4eb   :  { %3299 = vmatprep.subr.mxu0 %v3655_v53  ;;  %3304 = vmatprep.subr.mxu1 %v3655_v53 }
 0x4f1   :  { %317 = vrot.lane.b32.xlu1 %v3836_v50, %s3659_s14 }
 0x4f5   :  { %323 = vrot.lane.b32.xlu1 %v3836_v50, %s3660_s7 }
 0x4f9   :  { %329 = vrot.lane.b32.xlu1 %v3836_v50, %s3662_s0 }
 0x4fa   :  { %311 = vrot.lane.b32.xlu0 %v3836_v50, %s3661_s3 }
 0x530   :  { %v1832_v57 = vpop.xlane.xlu0 %1831 }
 0x531   :  { %3460 = vrcp.f32 %v1832_v57 }
 0x534   :  { %v1835_v59 = vpop.xlane.xlu1 %1834 }
 0x535   :  { %3462 = vrcp.f32 %v1835_v59 }
 0x536   :  { %v1838_v61 = vpop.xlane.xlu0 %1837 }
 0x537   :  { %3464 = vrcp.f32 %v1838_v61 }
 0x53b   :  { %v3461_v63 = vpop.eup %3460 }
 0x53c   :  { %v1855_v0 = vmul.f32 %v3461_v63, %v4048_v42 }
 0x53e   :  { %3292 = vmatmul.mubr.msk.f32.vlgmr.msra.gmra.mrb[6].mxu0 %vm1149_vm6, %v1855_v0  ;;  %v1841_v1 = vpop.xlane.xlu1 %1840 }
 0x53f   :  { %v3463_v2 = vpop.eup %3462  ;;  %3300 = vmatpush3.msra.mxu0 %v943_v56  ;;  %3466 = vrcp.f32 %v1841_v1  ;;  %3301 = vmatprep.mubr.msk.f32.mxu0 %vm3656_vm5, %v3655_v53 }
 0x540   :  { %v1857_v50 = vmul.f32 %v3463_v2, %v4052_v46  ;;  %3309 = vmatprep.subr.mxu0 %v3655_v53 }
 0x541   :  { %v3465_v3 = vpop.eup %3464 }
 0x542   :  { %v1859_v5 = vmul.f32 %v3465_v3, %v4056_v47  ;;  %3297 = vmatmul.mubr.msk.f32.vlgmr.msra.gmra.mrb[12].mxu1 %vm1149_vm6, %v1857_v50  ;;  %v1844_v47 = vpop.xlane.xlu0 %1843 }
 0x543   :  { %3305 = vmatpush3.msra.mxu1 %v944_v48  ;;  %3306 = vmatprep.mubr.msk.f32.mxu1 %vm3656_vm5, %v3655_v53  ;;  %3468 = vrcp.f32 %v1844_v47 }
 0x544   :  { %3302 = vmatmul.mubr.msk.f32.vlgmr.msra.gmra.mrb[8].mxu0 %vm1149_vm6, %v1859_v5  ;;  %3314 = vmatprep.subr.mxu1 %v3655_v53 }
 0x545   :  { %3311 = vmatprep.mubr.msk.f32.mxu0 %vm3656_vm5, %v3655_v53 }
 0x546   :  { %v1850_v6 = vpop.xlane.xlu0 %1849 }
 0x549   :  { %v3467_v42 = vpop.eup %3466 }
 0x54a   :  { %v1861_v46 = vmul.f32 %v3467_v42, %v4064_v60 }
 0x54c   :  { %3307 = vmatmul.mubr.msk.f32.vlgmr.msra.gmra.mrb[14].mxu1 %vm1149_vm6, %v1861_v46 }
 0x54d   :  { %3316 = vmatprep.mubr.msk.f32.mxu1 %vm3656_vm5, %v3655_v53  ;;  %v3469_v36 = vpop.eup %3468 }
 0x54e   :  { %v1863_v59 = vmul.f32 %v3469_v36, %v4060_v58 }
 0x56d   :  { %v1847_v7 = vpop.xlane.xlu1 %1846 }
 0x56e   :  { %3470 = vrcp.f32 %v1847_v7 }
 0x56f   :  { %3472 = vrcp.f32 %v1850_v6 }
 0x571   :  { %v318_v8 = vpop.permute.xlu1 %317  ;;  %v1853_v9 = vpop.xlane.xlu0 %1852 }
 0x572   :  { %3474 = vrcp.f32 %v1853_v9 }
 0x575   :  { %v324_v49 = vpop.permute.xlu1 %323  ;;  %v312_v51 = vpop.permute.xlu0 %311 }
 0x576   :  { %v673_v14 = vcombine.low %v312_v51, %v324_v49  ;;  %v674_v15 = vcombine.high %v312_v51, %v324_v49 }
 0x578   :  { %v681_v60 = vrot.slane %v673_v14, %v3862_v4  ;;  %v688_v19 = vrot.slane %v674_v15, %v3862_v4  ;;  %v3471_v41 = vpop.eup %3470 }
 0x579   :  { %v330_v16 = vpop.permute.xlu1 %329  ;;  %v3473_v44 = vpop.eup %3472  ;;  %v1865_v61 = vmul.f32 %v3471_v41, %v4076_v54 }
 0x57a   :  { %v689_v17 = vcombine.low %v318_v8, %v330_v16  ;;  %v690_v18 = vcombine.high %v318_v8, %v330_v16  ;;  %v1867_v1 = vmul.f32 %v3473_v44, %v4068_v62 }
 0x57c   :  { %v697_v10 = vrot.slane %v689_v17, %v3862_v4  ;;  %v704_v11 = vrot.slane %v690_v18, %v3862_v4  ;;  %v3475_v57 = vpop.eup %3474 }
 0x57d   :  { %v1869_v2 = vmul.f32 %v3475_v57, %v4084_v31 }
 0x57e   :  { %v705_v20 = vcombine.low %v681_v60, %v697_v10  ;;  %v706_v21 = vcombine.high %v681_v60, %v697_v10  ;;  %v721_v22 = vcombine.low %v688_v19, %v704_v11  ;;  %v722_v12 = vcombine.high %v688_v19, %v704_v11 }
 0x580   :  { %v713_v23 = vrot.slane %v705_v20, %v3864_v13  ;;  %v720_v24 = vrot.slane %v706_v21, %v3864_v13  ;;  %v729_v25 = vrot.slane %v721_v22, %v3864_v13  ;;  %v736_v26 = vrot.slane %v722_v12, %v3864_v13 }
 0x582   :  { %v1081_v27 = vcombine.low %v713_v23, %v720_v24  ;;  %v3139_v28 = vcombine.high %v713_v23, %v720_v24  ;;  %v1097_v29 = vcombine.low %v729_v25, %v736_v26  ;;  %v3140_v30 = vcombine.high %v729_v25, %v736_v26 }
 0x584   :  { %v1088_v32 = vrot.slane %v1081_v27, %v3862_v4  ;;  %v1096_v33 = vrot.slane %v3139_v28, %v3862_v4  ;;  %v1104_v34 = vrot.slane %v1097_v29, %v3862_v4  ;;  %v1112_v35 = vrot.slane %v3140_v30, %v3862_v4 }
 0x586   :  { %v1113_v37 = vcombine.low %v1088_v32, %v1096_v33  ;;  %v1129_v38 = vcombine.low %v1104_v34, %v1112_v35  ;;  %v1114_v39 = vcombine.high %v1088_v32, %v1096_v33  ;;  %v1130_v40 = vcombine.high %v1104_v34, %v1112_v35 }
 0x588   :  { %v1121_v52 = vrot.slane %v1113_v37, %v3864_v13  ;;  %v1137_v43 = vrot.slane %v1129_v38, %v3864_v13  ;;  %v1128_v45 = vrot.slane %v1114_v39, %v3864_v13  ;;  %v1144_v55 = vrot.slane %v1130_v40, %v3864_v13 }
 0x58a   :  { %v1145_v56 = vcombine.low %v1121_v52, %v1137_v43  ;;  %v1146_v48 = vcombine.high %v1121_v52, %v1137_v43  ;;  %v1147_v63 = vcombine.low %v1128_v45, %v1144_v55  ;;  %v1148_v0 = vcombine.high %v1128_v45, %v1144_v55 }
 0x58c   :  { %3310 = vmatpush3.msra.mxu0 %v1145_v56  ;;  %3315 = vmatpush3.msra.mxu1 %v1146_v48 }
 0x58d   :  { %3312 = vmatmul.mubr.msk.f32.vlgmr.msra.gmra.mrb[10].mxu0 %vm1149_vm6, %v1863_v59  ;;  %3317 = vmatmul.mubr.msk.f32.vlgmr.msra.gmra.mrb[16].mxu1 %vm1149_vm6, %v1865_v61 }
 0x58e   :  { %3319 = vmatprep.subr.mxu0 %v3655_v53  ;;  %3324 = vmatprep.subr.mxu1 %v3655_v53 }
 0x58f   :  { %3320 = vmatpush3.msra.mxu0 %v1147_v63  ;;  %3325 = vmatpush3.msra.mxu1 %v1148_v0 }
 0x590   :  { %3321 = vmatprep.mubr.msk.f32.mxu0 %vm3656_vm5, %v3655_v53  ;;  %3326 = vmatprep.mubr.msk.f32.mxu1 %vm3656_vm5, %v3655_v53 }
 0x591   :  { %3322 = vmatmul.mubr.msk.f32.vlgmr.msra.gmra.mrb[12].mxu0 %vm1149_vm6, %v1867_v1  ;;  %3327 = vmatmul.mubr.msk.f32.vlgmr.msra.gmra.mrb[18].mxu1 %vm1149_vm6, %v1869_v2 }
 0x611   :  { %v1939_v58 = vpop.f32.mrb[6].mxu0 }
 0x612   :  { %v3293_v54 = vpop.f32.mrb[7].mxu0 }
 0x615   :  { %v2012_v50 = vpop.f32.mrb[12].mxu1 }
 0x616   :  { %v3298_v3 = vpop.f32.mrb[13].mxu1 }
 0x617   :  { %v2085_v5 = vpop.f32.mrb[8].mxu0  ;;  %v2759_v3 = vld [vmem:[#allocation7 + $0x8] sm:$0xff] }
 0x618   :  { %v2454_v62 = vcombine.low %v1939_v58, %v2085_v5  ;;  %v2455_v42 = vcombine.high %v1939_v58, %v2085_v5  ;;  %v3303_v31 = vpop.f32.mrb[9].mxu0 }
 0x61a   :  { %v2462_v8 = vrot.slane %v2454_v62, %v3862_v4  ;;  %v2469_v53 = vrot.slane %v2455_v42, %v3862_v4 }
 0x61f   :  { %v2158_v46 = vpop.f32.mrb[14].mxu1 }
 0x620   :  { %v2470_v47 = vcombine.low %v2012_v50, %v2158_v46  ;;  %v2471_v6 = vcombine.high %v2012_v50, %v2158_v46  ;;  %v3308_v7 = vpop.f32.mrb[15].mxu1  ;;  %v2758_v50 = vld [vmem:[#allocation7] sm:$0xff] }
 0x621   :  { %v3378_v46 = vpack.c.bf16 %v2759_v3, %v2758_v50  ;;  %v2901_v50 = vld [vmem:[#allocation10 + $0x8] sm:$0xff]  ;;  %v2902_v3 = vld [vmem:[#allocation10 + $0x10] sm:$0xff] }
 0x622   :  { %v2478_v9 = vrot.slane %v2470_v47, %v3862_v4  ;;  %v2485_v49 = vrot.slane %v2471_v6, %v3862_v4 }
 0x623   :  { %3379 = vmatprep.subr.bf16.mxu0 %v3378_v46 }
 0x624   :  { %v2486_v51 = vcombine.low %v2462_v8, %v2478_v9  ;;  %v2487_v14 = vcombine.high %v2462_v8, %v2478_v9  ;;  %v2502_v15 = vcombine.low %v2469_v53, %v2485_v49  ;;  %v2503_v16 = vcombine.high %v2469_v53, %v2485_v49  ;;  %v2760_v53 = vld [vmem:[#allocation7 + $0x10] sm:$0xff]  ;;  %v2761_v9 = vld [vmem:[#allocation7 + $0x18] sm:$0xff]  ;;  %3381 = vmatpush3.bf16.msra.mxu0 %v3378_v46 }
 0x625   :  { %v2995_v46 = vld [vmem:[%s4282_s9 + $0x8] sm:$0xff] }
 0x626   :  { %v2494_v17 = vrot.slane %v2486_v51, %v3864_v13  ;;  %v2501_v18 = vrot.slane %v2487_v14, %v3864_v13  ;;  %v2510_v60 = vrot.slane %v2502_v15, %v3864_v13  ;;  %v2517_v19 = vrot.slane %v2503_v16, %v3864_v13 }
 0x627   :  { %v3382_v16 = vpack.c.bf16 %v2761_v9, %v2760_v53  ;;  %v2998_v53 = vld [vmem:[%s4282_s9 + $0x20] sm:$0xff]  ;;  %v2999_v9 = vld [vmem:[%s4282_s9 + $0x28] sm:$0xff] }
 0x628   :  { %v2590_v10 = vcombine.low %v2494_v17, %v2501_v18  ;;  %v3165_v11 = vcombine.high %v2494_v17, %v2501_v18  ;;  %v2606_v20 = vcombine.low %v2510_v60, %v2517_v19  ;;  %v3166_v21 = vcombine.high %v2510_v60, %v2517_v19 }
 0x629   :  { %3383 = vmatprep.subr.bf16.mxu0 %v3382_v16 }
 0x62a   :  { %v2597_v22 = vrot.slane %v2590_v10, %v3862_v4  ;;  %v2605_v12 = vrot.slane %v3165_v11, %v3862_v4  ;;  %v2613_v23 = vrot.slane %v2606_v20, %v3862_v4  ;;  %v2621_v24 = vrot.slane %v3166_v21, %v3862_v4  ;;  %3385 = vmatpush3.bf16.msra.mxu0 %v3382_v16 }
 0x62c   :  { %v2622_v25 = vcombine.low %v2597_v22, %v2605_v12  ;;  %v2638_v26 = vcombine.low %v2613_v23, %v2621_v24  ;;  %v2623_v27 = vcombine.high %v2597_v22, %v2605_v12  ;;  %v2639_v28 = vcombine.high %v2613_v23, %v2621_v24 }
 0x62e   :  { %v4167_v29 = vrot.slane %v2622_v25, %v3864_v13  ;;  %v4170_v30 = vrot.slane %v2638_v26, %v3864_v13  ;;  %v2637_v32 = vrot.slane %v2623_v27, %v3864_v13  ;;  %v2653_v33 = vrot.slane %v2639_v28, %v3864_v13 }
 0x630   :  { %v2655_v34 = vcombine.high %v4167_v29, %v4170_v30  ;;  %v2654_v35 = vcombine.low %v4167_v29, %v4170_v30  ;;  %v2656_v36 = vcombine.low %v2637_v32, %v2653_v33  ;;  %v2657_v37 = vcombine.high %v2637_v32, %v2653_v33 }
 0x632   :  { %2728 = vrot.lane.b32.xlu0 %v2655_v34, %s3643_s30 }
 0x636   :  { %2736 = vrot.lane.b32.xlu0 %v2656_v36, %s3663_s2 }
 0x63a   :  { %2744 = vrot.lane.b32.xlu0 %v2657_v37, %s3664_s17 }
 0x660   :  { %v2231_v38 = vpop.f32.mrb[10].mxu0  ;;  %v2304_v39 = vpop.f32.mrb[16].mxu1 }
 0x661   :  { %v3313_v40 = vpop.f32.mrb[11].mxu0  ;;  %v3318_v41 = vpop.f32.mrb[17].mxu1 }
 0x664   :  { %v2377_v52 = vpop.f32.mrb[12].mxu0  ;;  %v2450_v43 = vpop.f32.mrb[18].mxu1 }
 0x665   :  { %v2522_v44 = vcombine.low %v2231_v38, %v2377_v52  ;;  %v2523_v45 = vcombine.high %v2231_v38, %v2377_v52  ;;  %v2538_v55 = vcombine.low %v2304_v39, %v2450_v43  ;;  %v2539_v56 = vcombine.high %v2304_v39, %v2450_v43  ;;  %v3323_v48 = vpop.f32.mrb[13].mxu0  ;;  %v3328_v57 = vpop.f32.mrb[19].mxu1  ;;  %v3169_v39 = vld [vmem:[#allocation9] ss:$0 sm:$0xff]  ;;  %v3485_v43 = vld [vmem:[#allocation6] sm:$0xff] }
 0x667   :  { %v2530_v59 = vrot.slane %v2522_v44, %v3862_v4  ;;  %v2537_v61 = vrot.slane %v2523_v45, %v3862_v4  ;;  %v2546_v63 = vrot.slane %v2538_v55, %v3862_v4  ;;  %v2553_v0 = vrot.slane %v2539_v56, %v3862_v4 }
 0x669   :  { %v2554_v1 = vcombine.low %v2530_v59, %v2546_v63  ;;  %v2555_v2 = vcombine.high %v2530_v59, %v2546_v63  ;;  %v2570_v58 = vcombine.low %v2537_v61, %v2553_v0  ;;  %v2571_v54 = vcombine.high %v2537_v61, %v2553_v0 }
 0x66b   :  { %v2562_v5 = vrot.slane %v2554_v1, %v3864_v13  ;;  %v2569_v62 = vrot.slane %v2555_v2, %v3864_v13  ;;  %v2578_v42 = vrot.slane %v2570_v58, %v3864_v13  ;;  %v2585_v31 = vrot.slane %v2571_v54, %v3864_v13  ;;  %v2900_v54 = vld [vmem:[#allocation10] sm:$0xff] }
 0x66d   :  { %v2658_v47 = vcombine.low %v2562_v5, %v2569_v62  ;;  %v3167_v6 = vcombine.high %v2562_v5, %v2569_v62  ;;  %v2674_v7 = vcombine.low %v2578_v42, %v2585_v31  ;;  %v3168_v8 = vcombine.high %v2578_v42, %v2585_v31  ;;  %v2903_v62 = vld [vmem:[#allocation10 + $0x18] sm:$0xff]  ;;  %v2994_v31 = vld [vmem:[%s4282_s9] sm:$0xff] }
 0x66e   :  { %v3386_v5 = vpack.c.bf16 %v2901_v50, %v2900_v54  ;;  %v3390_v42 = vpack.c.bf16 %v2903_v62, %v2902_v3 }
 0x66f   :  { %v2665_v49 = vrot.slane %v2658_v47, %v3862_v4  ;;  %v2673_v51 = vrot.slane %v3167_v6, %v3862_v4  ;;  %v2681_v14 = vrot.slane %v2674_v7, %v3862_v4  ;;  %v2689_v15 = vrot.slane %v3168_v8, %v3862_v4  ;;  %v2996_v47 = vld [vmem:[%s4282_s9 + $0x10] sm:$0xff]  ;;  %v2997_v7 = vld [vmem:[%s4282_s9 + $0x18] sm:$0xff] }
 0x670   :  { %3387 = vmatprep.subr.bf16.mxu1 %v3386_v5  ;;  %v3394_v6 = vpack.c.bf16 %v2995_v46, %v2994_v31  ;;  %v3398_v8 = vpack.c.bf16 %v2997_v7, %v2996_v47 }
 0x671   :  { %v2690_v17 = vcombine.low %v2665_v49, %v2673_v51  ;;  %v2706_v18 = vcombine.low %v2681_v14, %v2689_v15  ;;  %v2691_v60 = vcombine.high %v2665_v49, %v2673_v51  ;;  %v2707_v19 = vcombine.high %v2681_v14, %v2689_v15  ;;  %3389 = vmatpush3.bf16.msra.mxu1 %v3386_v5 }
 0x672   :  { %3391 = vmatprep.subr.bf16.mxu1 %v3390_v42  ;;  %3395 = vmatprep.subr.bf16.mxu0 %v3394_v6  ;;  %v3402_v49 = vpack.c.bf16 %v2999_v9, %v2998_v53 }
 0x673   :  { %v2698_v10 = vrot.slane %v2690_v17, %v3864_v13  ;;  %v2714_v11 = vrot.slane %v2706_v18, %v3864_v13  ;;  %v2705_v20 = vrot.slane %v2691_v60, %v3864_v13  ;;  %v2721_v21 = vrot.slane %v2707_v19, %v3864_v13 }
 0x675   :  { %v2723_v22 = vcombine.high %v2698_v10, %v2714_v11  ;;  %v2722_v12 = vcombine.low %v2698_v10, %v2714_v11  ;;  %v2724_v23 = vcombine.low %v2705_v20, %v2721_v21  ;;  %v2725_v4 = vcombine.high %v2705_v20, %v2721_v21  ;;  %3393 = vmatpush3.bf16.msra.mxu1 %v3390_v42 }
 0x677   :  { %2730 = vrot.lane.b32.xlu1 %v2723_v22, %s3643_s30 }
 0x67b   :  { %2738 = vrot.lane.b32.xlu1 %v2724_v23, %s3663_s2 }
 0x67f   :  { %2746 = vrot.lane.b32.xlu1 %v2725_v4, %s3664_s17 }
 0x6a4   :  { %v2729_v24 = vpop.permute.xlu0 %2728 }
 0x6a5   :  { %v2750_v13 = vsel %vm1149_vm6, %v2654_v35, %v2729_v24  ;;  %v3484_v35 = vld [vmem:[#allocation6 + $0x8] sm:$0xff] }
 0x6a8   :  { %v2737_v25 = vpop.permute.xlu0 %2736 }
 0x6a9   :  { %v2753_v26 = vsel %vm2752_vm7, %v2750_v13, %v2737_v25  ;;  %v2894_v13 = vstv %s3116_s26 }
 0x6ac   :  { %v2745_v27 = vpop.permute.xlu0 %2744 }
 0x6ad   :  { %v2756_v28 = vsel %vm2755_vm8, %v2753_v26, %v2745_v27 }
 0x6ae   :  { %3337 = vmatprep.mubr.msk.f32.mxu0 %vm122_vm0, %v2756_v28  ;;  %v2897_v28 = vstv %s3117_s27 }
 0x6e9   :  { %v2731_v32 = vpop.permute.xlu1 %2730 }
 0x6ea   :  { %v2751_v34 = vsel %vm1149_vm6, %v2722_v12, %v2731_v32 }
 0x6ed   :  { %v2739_v33 = vpop.permute.xlu1 %2738 }
 0x6ee   :  { %v2754_v36 = vsel %vm2752_vm7, %v2751_v34, %v2739_v33 }
 0x6f1   :  { %v2747_v37 = vpop.permute.xlu1 %2746 }
 0x6f2   :  { %v2757_v38 = vsel %vm2755_vm8, %v2754_v36, %v2747_v37 }
 0x6f3   :  { %3338 = vmatmul.mubr.msk.f32.vlgmr.msra.gmra.mrb[14].mxu0 %vm122_vm0, %v2757_v38 }
 0x6f4   :  { %3397 = vmatpush3.bf16.msra.mxu0 %v3394_v6 }
 0x6f5   :  { %3399 = vmatprep.subr.bf16.mxu0 %v3398_v8 }
 0x6f8   :  { %3401 = vmatpush3.bf16.msra.mxu0 %v3398_v8 }
 0x6f9   :  { %3403 = vmatprep.subr.bf16.mxu0 %v3402_v49 }
 0x6fc   :  { %3405 = vmatpush3.bf16.msra.mxu0 %v3402_v49 }
 0x7c6   :  { %v3339_v40 = vpop.f32.mrb[14].mxu0 }
 0x7c7   :  { %v2847_v41 = vadd.f32 %v3339_v40, %v3169_v39  ;;  %v2841_v29 = vpop.f32.mrb[15].mxu0  ;;  %v3001_v40 = vld [vmem:[%s4282_s9 + $0x38] sm:$0xff] }
 0x7c8   :  { %v2842_v30 = vadd.f32 %v3169_v39, %v2841_v29  ;;  %v3000_v39 = vld [vmem:[%s4282_s9 + $0x30] sm:$0xff]  ;;  %s3665_s9 = smov [#allocation13]  }
 0x7c9   :  { %v4207_v52 = vadd.f32 %v3484_v35, %v2847_v41  ;;  %v3406_v41 = vpack.c.bf16 %v3001_v40, %v3000_v39  ;;  %v3172_v29 = vld [vmem:[#allocation12] ss:$0 sm:$0xff]  ;;  %s3100_s13 = sshll.u32 %s3665_s9, 4  ;;  %s3101_s13 = int_to_ptr.vmem [resolvable:$true] %s3100_s13 }
 0x7ca   :  { %v4209_v44 = vadd.f32 %v3485_v43, %v2842_v30  ;;  %s3608_s20 = scalar_lea.vmem %s3101_s13, 256  ;;  %p3613_p4 = scmp.lt.s32.totalorder %s3101_s13, %s3101_s13 }
 0x7cb   :  { %v2855_v45 = vsel %vm122_vm0, %v4207_v52, 0.0  ;;  %3407 = vmatprep.subr.bf16.mxu0 %v3406_v41  ;;  %p3609_p3 = scmp.ne.s32.totalorder %s3101_s13, %s3608_s20  ;;  %p3614_p5 = scmp.lt.s32.totalorder %s3608_s20, %s3608_s20 }
 0x7cc   :  { %2856 = vadd.xlane.f32.xlu1 %v2855_v45  ;;  %v2852_v55 = vsel %vm122_vm0, %v4209_v44, 0.0  ;;  %3409 = vmatpush3.bf16.msra.mxu0 %v3406_v41 }
 0x7cd   :  { %2853 = vadd.xlane.f32.xlu0 %v2852_v55  ;;  %p3615_p6 = por %p3614_p5, %p3613_p4 }
 0x7cf   :  { %p3616_p7 = pnand %p3615_p6, %p3609_p3 }
 0x859   :  { %v2857_v56 = vpop.xlane.xlu1 %2856 }
 0x85a   :  { %v4215_v48 = vmul.f32 0.03125, %v2857_v56  ;;  %v2854_v57 = vpop.xlane.xlu0 %2853 }
 0x85b   :  { %v2858_v59 = vmul.f32 0.03125, %v2854_v57 }
 0x85c   :  { %v2861_v61 = vsub.f32 %v4207_v52, %v4215_v48 }
 0x85d   :  { %v2860_v63 = vsub.f32 %v4209_v44, %v2858_v59 }
 0x85e   :  { %v2863_v1 = vmul.f32 %v2861_v61, %v2861_v61 }
 0x85f   :  { %v2862_v0 = vmul.f32 %v2860_v63, %v2860_v63 }
 0x860   :  { %v2867_v58 = vsel %vm122_vm0, %v2863_v1, 0.0 }
 0x861   :  { %v2864_v2 = vsel %vm122_vm0, %v2862_v0, 0.0 }
 0x862   :  { %2865 = vadd.xlane.f32.xlu0 %v2864_v2 }
 0x866   :  { %2868 = vadd.xlane.f32.xlu0 %v2867_v58 }
 0x8ef   :  { %v2866_v51 = vpop.xlane.xlu0 %2865 }
 0x8f0   :  { %v2870_v14 = vmul.f32 0.032258064, %v2866_v51 }
 0x8f2   :  { %3476 = vrsqrt.f32 %v2870_v14  ;;  %vm2874_vm9 = vcmp.eq.f32.partialorder %v2870_v14, inf  ;;  %v2877_v60 = vand.u32 2147483648, %v2870_v14  ;;  %vm2876_vm10 = vcmp.eq.f32.partialorder %v2870_v14, 0.0 }
 0x8f3   :  { %v2869_v15 = vpop.xlane.xlu0 %2868 }
 0x8f4   :  { %v2871_v16 = vmul.f32 0.032258064, %v2869_v15 }
 0x8f6   :  { %3478 = vrsqrt.f32 %v2871_v16  ;;  %vm2881_vm11 = vcmp.eq.f32.partialorder %v2871_v16, inf  ;;  %v2884_v22 = vand.u32 2147483648, %v2871_v16  ;;  %vm2883_vm12 = vcmp.eq.f32.partialorder %v2871_v16, 0.0 }
 0x8fc   :  { %v3477_v17 = vpop.eup %3476 }
 0x8fd   :  { %v2873_v18 = vmul.f32 %v3477_v17, %v2870_v14 }
 0x8ff   :  { %v2875_v19 = vsel %vm2874_vm9, %v2870_v14, %v2873_v18 }
 0x900   :  { %v3479_v10 = vpop.eup %3478  ;;  %v2878_v11 = vsel %vm2876_vm10, %v2877_v60, %v2875_v19 }
 0x901   :  { %v2886_v20 = vadd.f32 1e-06, %v2878_v11  ;;  %v2880_v21 = vmul.f32 %v3479_v10, %v2871_v16 }
 0x903   :  { %3480 = vrcp.f32 %v2886_v20  ;;  %v2882_v12 = vsel %vm2881_vm11, %v2871_v16, %v2880_v21 }
 0x904   :  { %v2885_v23 = vsel %vm2883_vm12, %v2884_v22, %v2882_v12 }
 0x905   :  { %v2887_v4 = vadd.f32 1e-06, %v2885_v23 }
 0x907   :  { %3482 = vrcp.f32 %v2887_v4 }
 0x90d   :  { %v3481_v24 = vpop.eup %3480 }
 0x90e   :  { %v2889_v25 = vmul.f32 %v3481_v24, %v2858_v59 }
 0x910   :  { %v2892_v26 = vsub.f32 %v4209_v44, %v2889_v25 }
 0x911   :  { %v3483_v27 = vpop.eup %3482 }
 0x912   :  { %v2891_v32 = vmul.f32 %v3483_v27, %v4215_v48  ;;  %v2895_v33 = vmul.f32 %v2894_v13, %v2892_v26  ;;  %v3175_v48 = vld [vmem:[%s4283_s10] ss:$0 sm:$0xff] }
 0x914   :  { %v2893_v34 = vsub.f32 %v4207_v52, %v2891_v32  ;;  %v2898_v36 = vadd.f32 %v2897_v28, %v2895_v33 }
 0x916   :  { %v2896_v37 = vmul.f32 %v2894_v13, %v2893_v34  ;;  %3348 = vmatprep.mubr.msk.f32.mxu1 %vm122_vm0, %v2898_v36 }
 0x918   :  { %v2899_v38 = vadd.f32 %v2897_v28, %v2896_v37 }
 0x91a   :  { %3349 = vmatmul.mubr.msk.f32.vlgmr.msra.gmra.mrb[20].mxu1 %vm122_vm0, %v2899_v38 }
 0x9ed   :  { %v3350_v30 = vpop.f32.mrb[20].mxu1 }
 0x9ee   :  { %v2989_v35 = vadd.f32 %v3350_v30, %v3172_v29  ;;  %v2983_v43 = vpop.f32.mrb[21].mxu1 }
 0x9ef   :  { %v2984_v45 = vadd.f32 %v3172_v29, %v2983_v43 }
 0x9f0   :  { %v2993_v56 = vmax.f32 %v2989_v35, 0.0 }
 0x9f1   :  { %v2992_v55 = vmax.f32 %v2984_v45, 0.0 }
 0x9f3   :  { %3367 = vmatprep.mubr.msk.f32.mxu0 %vm3009_vm13, %v2992_v55 }
 0x9f4   :  { %3368 = vmatmul.mubr.msk.f32.vlgmr.msra.gmra.mrb[16].mxu0 %vm3009_vm13, %v2993_v56 }
 0xac7   :  { %v3369_v57 = vpop.f32.mrb[16].mxu0 }
 0xac8   :  { %v3088_v59 = vadd.f32 %v3369_v57, %v3175_v48  ;;  %v3082_v61 = vpop.f32.mrb[17].mxu0 }
 0xac9   :  { %v3083_v63 = vadd.f32 %v3175_v48, %v3082_v61 }
 0xaca   :  { %v3092_v0 = vadd.f32 %v3088_v59, %v4207_v52 }
 0xacb   :  { %v3091_v1 = vadd.f32 %v3083_v63, %v4209_v44 }
 0xacc   :  { %3094 = vst.msk [vmem:[#allocation13 + $0x8] sm:$0xff] %vm122_vm0, %v3092_v0 }
 0xacd   :  { %3093 = vst.msk [vmem:[#allocation13] sm:$0xff] %vm122_vm0, %v3091_v1 }
 0xace   :  { %3619 = shalt.err (!%p3616_p7)
}
 0xacf   :  { %s3620_s0 = scalar_lea.hbm %s4284_s11, 256 }
 0xad0   :  { %p3621_p8 = scmp.ne.s32.totalorder %s4284_s11, %s3620_s0  ;;  %p3624_p9 = scmp.lt.u32.totalorder %s3620_s0, %s4284_s11 }
 0xad2   :  { %p3626_p10 = pnand %p3624_p9, %p3621_p8 }
 0xad4   :  { %3629 = shalt.err (!%p3626_p10)
}
 0xad5   :  { %3106 = dma.vmem_to_hbm [thread:$0]  %s3101_s13, 256, %s4284_s11, [#allocation4], %s3642_s29, %s3642_s29, %s3643_s30  }
 0xad6   :  { %3638 = dma.done.wait [#allocation4], 256  }
 0xad7   :  { %3639 = vsyncadd [#allocation4], 4294967040 }
 0xad8   :  { %3110 = vsyncpa [#allocation3], 1 }
 0xad9   :  { %3111 = vsyncpa [#allocation8], 1 }
 0xada   :  { %3112 = vsyncpa [#allocation11], 1 }
 0xadb   :  { %3113 = vsyncpa [#allocation4], 1 }
 0xadc   :  { %3114 = vsyncpa [#allocation5], 1 }

</bundles_post_ra>
